<compile_context>
chip_gen: v5e
topology: v5e:2x2
jax: 0.10.0
libtpu: 0.0.40
codegen_flags: <defaults>
</compile_context>

<pallas_src>
import math

import jax
import jax.numpy as jnp
from jax import lax
from jax.experimental import pallas as pl
from jax.experimental.pallas import tpu as pltpu

# ---------------- small, lane/MXU-aligned hyper-parameters ------------------
B = 2              # batch
N = 8              # sequence length
IN = 256           # in_features  (multiple of 256 -> full MXU K on v6e/v7x)
HIDDEN = 1024      # hidden_features = 4 * in_features
OUT = 256          # out_features (defaults to in_features in the module)
TM_TARGET = 256    # target row tile (full MXU row dimension on v6e/v7x)


def _round_up(a, b):
    return (a + b - 1) // b * b


def _gelu(x):
    # erf-based GELU, identical to the PyTorch reference `gelu` (f32 math).
    return x * 0.5 * (1.0 + lax.erf(x * (1.0 / math.sqrt(2.0))))


def mlp_kernel(x_ref, w1_ref, b1_ref, w2_ref, b2_ref, o_ref):
    x = x_ref[...]                                                # (TM, IN) bf16
    h = jnp.dot(x, w1_ref[...],
                preferred_element_type=jnp.float32) + b1_ref[...]  # (TM, HIDDEN) f32
    h = _gelu(h)                                                  # GELU in f32
    h = h.astype(jnp.bfloat16)                                    # bf16 into fc2
    y = jnp.dot(h, w2_ref[...],
                preferred_element_type=jnp.float32) + b2_ref[...]  # (TM, OUT) f32
    o_ref[...] = y.astype(o_ref.dtype)


def mlp_forward(x, params, *, tm_target=TM_TARGET):
    """x: (B, N, IN) float32 -> (B, N, OUT) float32."""
    b, n, c = x.shape
    m = b * n
    xm = x.reshape(m, c)

    # Row tile: full 256 MXU rows when M is big, shrink (multiple of 8) when tiny.
    tm = min(tm_target, _round_up(m, 8))
    m_pad = _round_up(m, tm)
    if m_pad != m:
        xm = jnp.pad(xm, ((0, m_pad - m), (0, 0)))
    xm = xm.astype(jnp.bfloat16)

    # bf16 weights (halve DMA bytes + VMEM); biases stay f32.
    w1 = params["w1_t"].astype(jnp.bfloat16)      # (IN, HIDDEN)
    w2 = params["w2_t"].astype(jnp.bfloat16)      # (HIDDEN, OUT)
    b1 = params["b1"]                             # (1, HIDDEN) f32
    b2 = params["b2"]                             # (1, OUT)    f32
    hidden = w1.shape[1]
    out_f = w2.shape[1]

    # Constant index_map -> weights/biases stay VMEM resident across the grid.
    resident = lambda arr: pl.BlockSpec(arr.shape, lambda i: (0, 0))

    out = pl.pallas_call(
        mlp_kernel,
        out_shape=jax.ShapeDtypeStruct((m_pad, out_f), jnp.float32),
        grid_spec=pl.GridSpec(
            grid=(m_pad // tm,),                              # row tiles
            in_specs=[
                pl.BlockSpec((tm, c), lambda i: (i, 0)),      # x row tile
                resident(w1),                                 # (IN, HIDDEN)
                resident(b1),                                 # (1, HIDDEN)
                resident(w2),                                 # (HIDDEN, OUT)
                resident(b2),                                 # (1, OUT)
            ],
            out_specs=pl.BlockSpec((tm, out_f), lambda i: (i, 0)),
        ),
        compiler_params=pltpu.CompilerParams(
            # "parallel": v7x's two TensorCores split the row tiles.
            dimension_semantics=("parallel",),
            vmem_limit_bytes=32 * 1024 * 1024,
        ),
    )(xm, w1, b1, w2, b2)
    return out[:m].reshape(b, n, out_f)


def init_params(key):
    """nn.Linear stores W as (out, in); we pass W.T so the kernel does x @ W.T."""
    k1, k2, k3, k4 = jax.random.split(key, 4)
    w1 = jax.random.normal(k1, (HIDDEN, IN), jnp.float32) * 0.02   # fc1.weight
    b1 = jax.random.normal(k2, (HIDDEN,), jnp.float32) * 0.02      # fc1.bias
    w2 = jax.random.normal(k3, (OUT, HIDDEN), jnp.float32) * 0.02  # fc2.weight
    b2 = jax.random.normal(k4, (OUT,), jnp.float32) * 0.02         # fc2.bias
    return {
        "w1_t": w1.T,                    # (IN, HIDDEN)
        "b1": b1.reshape(1, HIDDEN),
        "w2_t": w2.T,                    # (HIDDEN, OUT)
        "b2": b2.reshape(1, OUT),
    }


def mlp_reference(x, params):
    """Pure-JAX reference mirroring the kernel's bf16-operand / f32-accumulate flow."""
    xb = x.astype(jnp.bfloat16)
    w1 = params["w1_t"].astype(jnp.bfloat16)
    w2 = params["w2_t"].astype(jnp.bfloat16)
    h = jnp.dot(xb, w1, preferred_element_type=jnp.float32) + params["b1"]
    h = _gelu(h).astype(jnp.bfloat16)
    return jnp.dot(h, w2, preferred_element_type=jnp.float32) + params["b2"]


if __name__ == "__main__":
    key = jax.random.PRNGKey(0)
    kx, kp = jax.random.split(key)
    x = jax.random.normal(kx, (B, N, IN), jnp.float32)
    params = init_params(kp)

    out = mlp_forward(x, params)
    jax.block_until_ready(out)
    assert out.shape == (B, N, OUT)

    ref = mlp_reference(x.reshape(B * N, IN), params).reshape(B, N, OUT)
    # bf16 matmul operands -> compare against the bf16-matched reference with a
    # correspondingly relaxed tolerance (the old 1e-5 f32 tolerance no longer applies).
    assert jnp.allclose(out, ref, atol=1e-2, rtol=1e-2), "mismatch vs reference"

    print("KERNEL_OK")
</pallas_src>

<mosaic_0001>
module attributes {stable_mosaic.version = 11 : i64} {
  func.func @mlp_kernel(%arg0: i32, %arg1: memref<16x256xbf16, #tpu.memory_space<vmem>>, %arg2: memref<256x1024xbf16, #tpu.memory_space<vmem>>, %arg3: memref<1x1024xf32, #tpu.memory_space<vmem>>, %arg4: memref<1024x256xbf16, #tpu.memory_space<vmem>>, %arg5: memref<1x256xf32, #tpu.memory_space<vmem>>, %arg6: memref<16x256xf32, #tpu.memory_space<vmem>>) attributes {dimension_semantics = [#tpu.dimension_semantics<parallel>], iteration_bounds = array<i64: 1>, scalar_prefetch = 0 : i64, scratch_operands = 0 : i64, tpu.core_type = #tpu.core_type<tc>, window_params = [{transform_indices = @transform_0, window_bounds = array<i64: 16, 256>}, {pipeline_mode = #tpu.pipeline_mode<synchronous>, transform_indices = @transform_1, window_bounds = array<i64: 256, 1024>}, {pipeline_mode = #tpu.pipeline_mode<synchronous>, transform_indices = @transform_2, window_bounds = array<i64: 1, 1024>}, {pipeline_mode = #tpu.pipeline_mode<synchronous>, transform_indices = @transform_3, window_bounds = array<i64: 1024, 256>}, {pipeline_mode = #tpu.pipeline_mode<synchronous>, transform_indices = @transform_4, window_bounds = array<i64: 1, 256>}, {transform_indices = @transform_5, window_bounds = array<i64: 16, 256>}]} {
    %c0 = arith.constant 0 : index
    %c0_0 = arith.constant 0 : index
    %0 = vector.load %arg1[%c0, %c0_0] : memref<16x256xbf16, #tpu.memory_space<vmem>>, vector<16x256xbf16>
    %c0_1 = arith.constant 0 : index
    %c0_2 = arith.constant 0 : index
    %1 = vector.load %arg2[%c0_1, %c0_2] : memref<256x1024xbf16, #tpu.memory_space<vmem>>, vector<256x1024xbf16>
    %cst = arith.constant dense<0.000000e+00> : vector<16x1024xf32>
    %2 = tpu.matmul %0, %1, %cst {dimension_numbers = #tpu.dot_dimension_numbers<[1], [0], [0], [1], [0, 0, 1, 1], [], []>} : vector<16x256xbf16>, vector<256x1024xbf16>, vector<16x1024xf32> -> vector<16x1024xf32>
    %c0_3 = arith.constant 0 : index
    %c0_4 = arith.constant 0 : index
    %3 = vector.load %arg3[%c0_3, %c0_4] : memref<1x1024xf32, #tpu.memory_space<vmem>>, vector<1x1024xf32>
    %4 = vector.broadcast %3 : vector<1x1024xf32> to vector<16x1024xf32>
    %5 = arith.addf %2, %4 : vector<16x1024xf32>
    %cst_5 = arith.constant 5.000000e-01 : f32
    %6 = vector.broadcast %cst_5 : f32 to vector<16x1024xf32>
    %7 = arith.mulf %5, %6 : vector<16x1024xf32>
    %cst_6 = arith.constant 0.707106769 : f32
    %8 = vector.broadcast %cst_6 : f32 to vector<16x1024xf32>
    %9 = arith.mulf %5, %8 : vector<16x1024xf32>
    %10 = math.erf %9 : vector<16x1024xf32>
    %cst_7 = arith.constant 1.000000e+00 : f32
    %11 = vector.broadcast %cst_7 : f32 to vector<16x1024xf32>
    %12 = arith.addf %11, %10 : vector<16x1024xf32>
    %13 = arith.mulf %7, %12 : vector<16x1024xf32>
    %14 = arith.truncf %13 : vector<16x1024xf32> to vector<16x1024xbf16>
    %c0_8 = arith.constant 0 : index
    %c0_9 = arith.constant 0 : index
    %15 = vector.load %arg4[%c0_8, %c0_9] : memref<1024x256xbf16, #tpu.memory_space<vmem>>, vector<1024x256xbf16>
    %cst_10 = arith.constant dense<0.000000e+00> : vector<16x256xf32>
    %16 = tpu.matmul %14, %15, %cst_10 {dimension_numbers = #tpu.dot_dimension_numbers<[1], [0], [0], [1], [0, 0, 1, 1], [], []>} : vector<16x1024xbf16>, vector<1024x256xbf16>, vector<16x256xf32> -> vector<16x256xf32>
    %c0_11 = arith.constant 0 : index
    %c0_12 = arith.constant 0 : index
    %17 = vector.load %arg5[%c0_11, %c0_12] : memref<1x256xf32, #tpu.memory_space<vmem>>, vector<1x256xf32>
    %18 = vector.broadcast %17 : vector<1x256xf32> to vector<16x256xf32>
    %19 = arith.addf %16, %18 : vector<16x256xf32>
    %c0_13 = arith.constant 0 : index
    %c0_14 = arith.constant 0 : index
    %20 = vector.load %arg6[%c0_13, %c0_14] : memref<16x256xf32, #tpu.memory_space<vmem>>, vector<16x256xf32>
    tpu.vector_store %arg6[%c0_13, %c0_14], %19 {strides = array<i32>} : memref<16x256xf32, #tpu.memory_space<vmem>>, vector<16x256xf32>,
    return
  }
  func.func @transform_0(%arg0: i32) -> (i32, i32) {
    %c0_i32 = arith.constant 0 : i32
    %c0_i32_0 = arith.constant 0 : i32
    return %arg0, %c0_i32 : i32, i32
  }
  func.func @transform_1(%arg0: i32) -> (i32, i32) {
    %c0_i32 = arith.constant 0 : i32
    %c0_i32_0 = arith.constant 0 : i32
    %c0_i32_1 = arith.constant 0 : i32
    return %c0_i32, %c0_i32_0 : i32, i32
  }
  func.func @transform_2(%arg0: i32) -> (i32, i32) {
    %c0_i32 = arith.constant 0 : i32
    %c0_i32_0 = arith.constant 0 : i32
    %c0_i32_1 = arith.constant 0 : i32
    return %c0_i32, %c0_i32_0 : i32, i32
  }
  func.func @transform_3(%arg0: i32) -> (i32, i32) {
    %c0_i32 = arith.constant 0 : i32
    %c0_i32_0 = arith.constant 0 : i32
    %c0_i32_1 = arith.constant 0 : i32
    return %c0_i32, %c0_i32_0 : i32, i32
  }
  func.func @transform_4(%arg0: i32) -> (i32, i32) {
    %c0_i32 = arith.constant 0 : i32
    %c0_i32_0 = arith.constant 0 : i32
    %c0_i32_1 = arith.constant 0 : i32
    return %c0_i32, %c0_i32_0 : i32, i32
  }
  func.func @transform_5(%arg0: i32) -> (i32, i32) {
    %c0_i32 = arith.constant 0 : i32
    %c0_i32_0 = arith.constant 0 : i32
    return %arg0, %c0_i32 : i32, i32
  }
}

</mosaic_0001>

<bundles_post_ra>
// kernel: tpu_custom_call.1
= control target key start
LH: loop header
LB: loop body
LE: loop exit
PB: predicated region body
PF: predicated region fallthrough
CT: control target
= control target key end

     0   :  { %10 = vsyncpa [#allocation3], 0  ;;  %s5230_s0 = inlined_call_operand.hbm [shape: bf16[16,256], index: 0, kind: input, shape index: {}]   ;;  %s5231_s1 = inlined_call_operand.hbm [shape: bf16[256,1024], index: 1, kind: input, shape index: {}]   ;;  %s5232_s2 = inlined_call_operand.hbm [shape: f32[1,1024], index: 2, kind: input, shape index: {}]   ;;  %s5233_s3 = inlined_call_operand.hbm [shape: bf16[1024,256], index: 3, kind: input, shape index: {}]   ;;  %s5234_s4 = inlined_call_operand.vmem [shape: f32[1,256], index: 4, kind: input, shape index: {}]   ;;  %s5235_s5 = inlined_call_operand.hbm [shape: f32[16,256], index: 5, kind: output, shape index: {}]  }
   0x1   :  { %11 = vsyncpa [#allocation6], 0 }
   0x2   :  { %12 = vsyncpa [#allocation9], 0  ;;  %s31_s20 = sshll.u32 %s5231_s1, 4  ;;  %s32_s20 = int_to_ptr.hbm [resolvable:$true] %s31_s20 }
   0x3   :  { %13 = vsyncpa [#allocation4], 0  ;;  %s4317_s21 = smov [#allocation5]   ;;  %s18_s25 = sshll.u32 %s5230_s0, 4  ;;  %s19_s25 = int_to_ptr.hbm [resolvable:$true] %s18_s25 }
   0x4   :  { %s33_s22 = sshll.u32 %s4317_s21, 4  ;;  %s4318_s26 = smov 512   ;;  %s34_s22 = int_to_ptr.vmem [resolvable:$true] %s33_s22 }
   0x5   :  { %s4319_s27 = smov 32   ;;  %s4320_s28 = smov [#allocation2]  }
   0x6   :  { %39 = dma.hbm_to_vmem [thread:$0]  %s32_s20, 16384, %s34_s22, [#allocation6], %s4318_s26, %s4318_s26, %s4319_s27  }
   0x7   :  { %s20_s29 = sshll.u32 %s4320_s28, 4  ;;  %s4321_s30 = smov 128   ;;  %s21_s29 = int_to_ptr.vmem [resolvable:$true] %s20_s29 }
   0x8   :  { %s4322_s6 = smov 8   ;;  %s45_s8 = sshll.u32 %s5232_s2, 4  ;;  %s46_s8 = int_to_ptr.hbm [resolvable:$true] %s45_s8 }
   0x9   :  { %26 = dma.hbm_to_vmem [thread:$0]  %s19_s25, 256, %s21_s29, [#allocation3], %s4321_s30, %s4321_s30, %s4322_s6  }
   0xa   :  { %s4323_s9 = smov [#allocation7]   ;;  %s55_s12 = sshll.u32 %s5233_s3, 4  ;;  %s56_s12 = int_to_ptr.hbm [resolvable:$true] %s55_s12 }
   0xb   :  { %s47_s10 = sshll.u32 %s4323_s9, 4  ;;  %s4324_s13 = smov [#allocation8]   ;;  %s48_s10 = int_to_ptr.vmem [resolvable:$true] %s47_s10 }
   0xc   :  { %50 = dma.hbm_to_vmem [thread:$0]  %s46_s8, 128, %s48_s10, [#allocation6]  }
   0xd   :  { %s57_s14 = sshll.u32 %s4324_s13, 4  ;;  %s58_s14 = int_to_ptr.vmem [resolvable:$true] %s57_s14 }
   0xe   :  { %63 = dma.hbm_to_vmem [thread:$0]  %s56_s12, 16384, %s58_s14, [#allocation9], %s4321_s30, %s4321_s30, %s4322_s6  }
   0xf   :  { %4309 = dma.done.wait [#allocation3], 256  }
  0x10   :  { %4310 = vsyncadd [#allocation3], 4294967040 }
  0x11   :  { %4311 = dma.done.wait [#allocation6], 16512  }
  0x12   :  { %4312 = vsyncadd [#allocation6], 4294950784 }
  0x13   :  { %4313 = dma.done.wait [#allocation9], 16384  }
  0x14   :  { %4314 = vsyncadd [#allocation9], 4294950912  ;;  %v3073_v0 = vld [vmem:[#allocation5 + $0x1c0] sm:$0xf]  ;;  %v3945_v5 = vld [vmem:[#allocation5 + $0x1c4] sm:$0xf] }
  0x15   :  { %v3949_v1 = vld [vmem:[#allocation5 + $0x1dc] sm:$0xf0]  ;;  %v3075_v6 = vld [vmem:[#allocation5 + $0x1e0] sm:$0xf0]  ;;  %s2824_s18 = sshll.u32 %s5235_s5, 4  ;;  %s4326_s19 = smov 256   ;;  %s2825_s18 = int_to_ptr.hbm [resolvable:$true] %s2824_s18 }
  0x16   :  { %v3329_v2 = vld [vmem:[#allocation5 + $0x3c0] sm:$0xf]  ;;  %v3074_v3 = vor.u32 %v3949_v1, %v3073_v0  ;;  %v3078_v8 = vor.u32 %v3945_v5, %v3075_v6  ;;  %v4009_v9 = vld [vmem:[#allocation5 + $0x3c4] sm:$0xf]  ;;  %s4327_s20 = smov 16  }
  0x17   :  { %v4013_v4 = vld [vmem:[#allocation5 + $0x3dc] sm:$0xf0]  ;;  %v3331_v10 = vld [vmem:[#allocation5 + $0x3e0] sm:$0xf0] }
  0x18   :  { %v3330_v7 = vor.u32 %v4013_v4, %v3329_v2  ;;  %v3041_v11 = vld [vmem:[#allocation5 + $0x180] sm:$0xf]  ;;  %880 = vmatpush.bf16.msra.mxu0 %v3074_v3  ;;  %v3334_v12 = vor.u32 %v4009_v9, %v3331_v10  ;;  %908 = vmatpush.bf16.msra.mxu2 %v3078_v8  ;;  %v3937_v18 = vld [vmem:[#allocation5 + $0x184] sm:$0xf] }
  0x19   :  { %v3941_v13 = vld [vmem:[#allocation5 + $0x19c] sm:$0xf0]  ;;  %v3043_v19 = vld [vmem:[#allocation5 + $0x1a0] sm:$0xf0] }
  0x1a   :  { %v3297_v14 = vld [vmem:[#allocation5 + $0x380] sm:$0xf]  ;;  %894 = vmatpush.bf16.msra.mxu1 %v3330_v7  ;;  %v3042_v16 = vor.u32 %v3941_v13, %v3041_v11  ;;  %v4001_v20 = vld [vmem:[#allocation5 + $0x384] sm:$0xf]  ;;  %922 = vmatpush.bf16.msra.mxu3 %v3334_v12  ;;  %v3046_v21 = vor.u32 %v3937_v18, %v3043_v19 }
  0x1b   :  { %v4005_v15 = vld [vmem:[#allocation5 + $0x39c] sm:$0xf0]  ;;  %v3299_v22 = vld [vmem:[#allocation5 + $0x3a0] sm:$0xf0] }
  0x1c   :  { %v3298_v17 = vor.u32 %v4005_v15, %v3297_v14  ;;  %v3009_v23 = vld [vmem:[#allocation5 + $0x140] sm:$0xf]  ;;  %v3302_v25 = vor.u32 %v4001_v20, %v3299_v22  ;;  %v3929_v28 = vld [vmem:[#allocation5 + $0x144] sm:$0xf]  ;;  %881 = vmatpush.bf16.msra.mxu0 %v3042_v16  ;;  %909 = vmatpush.bf16.msra.mxu2 %v3046_v21 }
  0x1d   :  { %v3933_v24 = vld [vmem:[#allocation5 + $0x15c] sm:$0xf0]  ;;  %v3011_v30 = vld [vmem:[#allocation5 + $0x160] sm:$0xf0] }
  0x1e   :  { %v3265_v26 = vld [vmem:[#allocation5 + $0x340] sm:$0xf]  ;;  %v3010_v29 = vor.u32 %v3933_v24, %v3009_v23  ;;  %v3993_v31 = vld [vmem:[#allocation5 + $0x344] sm:$0xf]  ;;  %895 = vmatpush.bf16.msra.mxu1 %v3298_v17  ;;  %v3014_v34 = vor.u32 %v3929_v28, %v3011_v30  ;;  %923 = vmatpush.bf16.msra.mxu3 %v3302_v25  ;;  %v3081_v28 = vld [vmem:[#allocation5 + $0x1c8] sm:$0xf] }
  0x1f   :  { %v3997_v27 = vld [vmem:[#allocation5 + $0x35c] sm:$0xf0]  ;;  %v3267_v32 = vld [vmem:[#allocation5 + $0x360] sm:$0xf0]  ;;  %v3337_v30 = vld [vmem:[#allocation5 + $0x3c8] sm:$0xf] }
  0x20   :  { %v3266_v33 = vor.u32 %v3997_v27, %v3265_v26  ;;  %v2977_v35 = vld [vmem:[#allocation5 + $0x100] sm:$0xf]  ;;  %v3270_v38 = vor.u32 %v3993_v31, %v3267_v32  ;;  %v3921_v40 = vld [vmem:[#allocation5 + $0x104] sm:$0xf]  ;;  %882 = vmatpush.bf16.msra.mxu0 %v3010_v29  ;;  %910 = vmatpush.bf16.msra.mxu2 %v3014_v34  ;;  %v3950_v29 = vld [vmem:[#allocation5 + $0x1e4] sm:$0xf0] }
  0x21   :  { %v3925_v36 = vld [vmem:[#allocation5 + $0x11c] sm:$0xf0]  ;;  %v2979_v41 = vld [vmem:[#allocation5 + $0x120] sm:$0xf0]  ;;  %v4014_v31 = vld [vmem:[#allocation5 + $0x3e4] sm:$0xf0] }
  0x22   :  { %v3233_v37 = vld [vmem:[#allocation5 + $0x300] sm:$0xf]  ;;  %v3985_v42 = vld [vmem:[#allocation5 + $0x304] sm:$0xf]  ;;  %v2978_v44 = vor.u32 %v3925_v36, %v2977_v35  ;;  %896 = vmatpush.bf16.msra.mxu1 %v3266_v33  ;;  %v2982_v46 = vor.u32 %v3921_v40, %v2979_v41  ;;  %924 = vmatpush.bf16.msra.mxu3 %v3270_v38  ;;  %v3946_v33 = vld [vmem:[#allocation5 + $0x1cc] sm:$0xf] }
  0x23   :  { %v3989_v39 = vld [vmem:[#allocation5 + $0x31c] sm:$0xf0]  ;;  %v3235_v43 = vld [vmem:[#allocation5 + $0x320] sm:$0xf0]  ;;  %v3083_v34 = vld [vmem:[#allocation5 + $0x1e8] sm:$0xf0] }
  0x24   :  { %v3234_v45 = vor.u32 %v3989_v39, %v3233_v37  ;;  %v2945_v47 = vld [vmem:[#allocation5 + $0xc0] sm:$0xf]  ;;  %v3238_v50 = vor.u32 %v3985_v42, %v3235_v43  ;;  %v3913_v52 = vld [vmem:[#allocation5 + $0xc4] sm:$0xf]  ;;  %883 = vmatpush.bf16.msra.mxu0 %v2978_v44  ;;  %911 = vmatpush.bf16.msra.mxu2 %v2982_v46  ;;  %v4010_v35 = vld [vmem:[#allocation5 + $0x3cc] sm:$0xf]  ;;  %v3082_v42 = vor.u32 %v3950_v29, %v3081_v28 }
  0x25   :  { %v3917_v48 = vld [vmem:[#allocation5 + $0xdc] sm:$0xf0]  ;;  %v2947_v53 = vld [vmem:[#allocation5 + $0xe0] sm:$0xf0]  ;;  %v3339_v38 = vld [vmem:[#allocation5 + $0x3e8] sm:$0xf0]  ;;  %v3086_v46 = vor.u32 %v3946_v33, %v3083_v34 }
  0x26   :  { %v3201_v49 = vld [vmem:[#allocation5 + $0x2c0] sm:$0xf]  ;;  %v3977_v54 = vld [vmem:[#allocation5 + $0x2c4] sm:$0xf]  ;;  %v2946_v56 = vor.u32 %v3917_v48, %v2945_v47  ;;  %897 = vmatpush.bf16.msra.mxu1 %v3234_v45  ;;  %v2950_v58 = vor.u32 %v3913_v52, %v2947_v53  ;;  %925 = vmatpush.bf16.msra.mxu3 %v3238_v50  ;;  %v2841_v39 = vld [vmem:[#allocation2] sm:$0xf]  ;;  %v3338_v45 = vor.u32 %v4014_v31, %v3337_v30 }
  0x27   :  { %v3981_v51 = vld [vmem:[#allocation5 + $0x2dc] sm:$0xf0]  ;;  %v3203_v55 = vld [vmem:[#allocation5 + $0x2e0] sm:$0xf0]  ;;  %v3888_v40 = vld [vmem:[#allocation2 + $0x4] sm:$0xf0]  ;;  %v3342_v50 = vor.u32 %v4010_v35, %v3339_v38 }
  0x28   :  { %v3202_v57 = vor.u32 %v3981_v51, %v3201_v49  ;;  %v2913_v59 = vld [vmem:[#allocation5 + $0x80] sm:$0xf]  ;;  %v3206_v62 = vor.u32 %v3977_v54, %v3203_v55  ;;  %v3905_v0 = vld [vmem:[#allocation5 + $0x84] sm:$0xf]  ;;  %884 = vmatpush.bf16.msra.mxu0 %v2946_v56  ;;  %912 = vmatpush.bf16.msra.mxu2 %v2950_v58  ;;  %v3887_v43 = vld [vmem:[#allocation2 + $0x4] sm:$0xf]  ;;  %v4370_v51 = vor.u32 %v3888_v40, %v2841_v39 }
  0x29   :  { %v3909_v60 = vld [vmem:[#allocation5 + $0x9c] sm:$0xf0]  ;;  %v2915_v1 = vld [vmem:[#allocation5 + $0xa0] sm:$0xf0]  ;;  %v2843_v44 = vld [vmem:[#allocation2 + $0x8] sm:$0xf0] }
  0x2a   :  { %v3169_v61 = vld [vmem:[#allocation5 + $0x280] sm:$0xf]  ;;  %v3969_v2 = vld [vmem:[#allocation5 + $0x284] sm:$0xf]  ;;  %v2914_v4 = vor.u32 %v3909_v60, %v2913_v59  ;;  %898 = vmatpush.bf16.msra.mxu1 %v3202_v57  ;;  %v2918_v6 = vor.u32 %v3905_v0, %v2915_v1  ;;  %926 = vmatpush.bf16.msra.mxu3 %v3206_v62  ;;  %v3049_v47 = vld [vmem:[#allocation5 + $0x188] sm:$0xf]  ;;  %v4372_v55 = vor.u32 %v3887_v43, %v2843_v44 }
  0x2b   :  { %v3973_v63 = vld [vmem:[#allocation5 + $0x29c] sm:$0xf0]  ;;  %v3171_v3 = vld [vmem:[#allocation5 + $0x2a0] sm:$0xf0]  ;;  %v3942_v48 = vld [vmem:[#allocation5 + $0x1a4] sm:$0xf0] }
  0x2c   :  { %v3170_v5 = vor.u32 %v3973_v63, %v3169_v61  ;;  %v2881_v7 = vld [vmem:[#allocation5 + $0x40] sm:$0xf]  ;;  %v3174_v10 = vor.u32 %v3969_v2, %v3171_v3  ;;  %v3897_v12 = vld [vmem:[#allocation5 + $0x44] sm:$0xf]  ;;  %885 = vmatpush.bf16.msra.mxu0 %v2914_v4  ;;  %913 = vmatpush.bf16.msra.mxu2 %v2918_v6  ;;  %v3305_v49 = vld [vmem:[#allocation5 + $0x388] sm:$0xf]  ;;  %v3050_v58 = vor.u32 %v3942_v48, %v3049_v47 }
  0x2d   :  { %v3901_v8 = vld [vmem:[#allocation5 + $0x5c] sm:$0xf0]  ;;  %v2883_v13 = vld [vmem:[#allocation5 + $0x60] sm:$0xf0]  ;;  %v4006_v52 = vld [vmem:[#allocation5 + $0x3a4] sm:$0xf0] }
  0x2e   :  { %v3137_v9 = vld [vmem:[#allocation5 + $0x240] sm:$0xf]  ;;  %v3961_v14 = vld [vmem:[#allocation5 + $0x244] sm:$0xf]  ;;  %v2882_v16 = vor.u32 %v3901_v8, %v2881_v7  ;;  %899 = vmatpush.bf16.msra.mxu1 %v3170_v5  ;;  %v2886_v21 = vor.u32 %v3897_v12, %v2883_v13  ;;  %927 = vmatpush.bf16.msra.mxu3 %v3174_v10  ;;  %v3938_v53 = vld [vmem:[#allocation5 + $0x18c] sm:$0xf]  ;;  %v3306_v59 = vor.u32 %v4006_v52, %v3305_v49 }
  0x2f   :  { %v3965_v11 = vld [vmem:[#allocation5 + $0x25c] sm:$0xf0]  ;;  %v3139_v15 = vld [vmem:[#allocation5 + $0x260] sm:$0xf0]  ;;  %v3051_v54 = vld [vmem:[#allocation5 + $0x1a8] sm:$0xf0] }
  0x30   :  { %v2849_v17 = vld [vmem:[#allocation5] sm:$0xf]  ;;  %v3138_v20 = vor.u32 %v3965_v11, %v3137_v9  ;;  %v3889_v23 = vld [vmem:[#allocation5 + $0x4] sm:$0xf]  ;;  %v3142_v25 = vor.u32 %v3961_v14, %v3139_v15  ;;  %886 = vmatpush.bf16.msra.mxu0 %v2882_v16  ;;  %914 = vmatpush.bf16.msra.mxu2 %v2886_v21  ;;  %v4002_v56 = vld [vmem:[#allocation5 + $0x38c] sm:$0xf]  ;;  %v3054_v60 = vor.u32 %v3938_v53, %v3051_v54 }
  0x31   :  { %v3893_v18 = vld [vmem:[#allocation5 + $0x1c] sm:$0xf0]  ;;  %v2851_v24 = vld [vmem:[#allocation5 + $0x20] sm:$0xf0]  ;;  %v3307_v57 = vld [vmem:[#allocation5 + $0x3a8] sm:$0xf0] }
  0x32   :  { %v3105_v19 = vld [vmem:[#allocation5 + $0x200] sm:$0xf]  ;;  %v3953_v26 = vld [vmem:[#allocation5 + $0x204] sm:$0xf]  ;;  %v2850_v32 = vor.u32 %v3893_v18, %v2849_v17  ;;  %900 = vmatpush.bf16.msra.mxu1 %v3138_v20  ;;  %v2854_v37 = vor.u32 %v3889_v23, %v2851_v24  ;;  %928 = vmatpush.bf16.msra.mxu3 %v3142_v25  ;;  %v3017_v61 = vld [vmem:[#allocation5 + $0x148] sm:$0xf]  ;;  %v3310_v0 = vor.u32 %v4002_v56, %v3307_v57 }
  0x33   :  { %v3957_v22 = vld [vmem:[#allocation5 + $0x21c] sm:$0xf0]  ;;  %v3107_v27 = vld [vmem:[#allocation5 + $0x220] sm:$0xf0]  ;;  %v3934_v62 = vld [vmem:[#allocation5 + $0x164] sm:$0xf0] }
  0x34   :  { %v3106_v36 = vor.u32 %v3957_v22, %v3105_v19  ;;  %v3110_v41 = vor.u32 %v3953_v26, %v3107_v27  ;;  %887 = vmatpush.bf16.msra.mxu0 %v2850_v32  ;;  %915 = vmatpush.bf16.msra.mxu2 %v2854_v37  ;;  %v3273_v63 = vld [vmem:[#allocation5 + $0x348] sm:$0xf]  ;;  %v3930_v2 = vld [vmem:[#allocation5 + $0x14c] sm:$0xf]  ;;  %v3018_v6 = vor.u32 %v3934_v62, %v3017_v61 }
  0x35   :  { %v3998_v1 = vld [vmem:[#allocation5 + $0x364] sm:$0xf0]  ;;  %v3019_v3 = vld [vmem:[#allocation5 + $0x168] sm:$0xf0] }
  0x36   :  { %901 = vmatpush.bf16.msra.mxu1 %v3106_v36  ;;  %929 = vmatpush.bf16.msra.mxu3 %v3110_v41  ;;  %v3994_v4 = vld [vmem:[#allocation5 + $0x34c] sm:$0xf]  ;;  %v3274_v7 = vor.u32 %v3998_v1, %v3273_v63  ;;  %v3022_v8 = vor.u32 %v3930_v2, %v3019_v3  ;;  %v2985_v9 = vld [vmem:[#allocation5 + $0x108] sm:$0xf] }
  0x37   :  { %888 = vmatmul.bf16.vlgmr.msra.gmra.mxu0 %v4370_v51  ;;  %916 = vmatmul.bf16.vlgmr.msra.gmra.mxu2 %v4370_v51  ;;  %v3275_v5 = vld [vmem:[#allocation5 + $0x368] sm:$0xf0]  ;;  %v3926_v10 = vld [vmem:[#allocation5 + $0x124] sm:$0xf0] }
  0x38   :  { %936 = vmatpush.bf16.msrb.mxu0 %v3082_v42  ;;  %964 = vmatpush.bf16.msrb.mxu2 %v3086_v46  ;;  %v3241_v11 = vld [vmem:[#allocation5 + $0x308] sm:$0xf]  ;;  %v3278_v12 = vor.u32 %v3994_v4, %v3275_v5  ;;  %v3922_v14 = vld [vmem:[#allocation5 + $0x10c] sm:$0xf]  ;;  %v2986_v18 = vor.u32 %v3926_v10, %v2985_v9  ;;  %v3089_v4 = vld [vmem:[#allocation5 + $0x1d0] sm:$0xf] }
  0x39   :  { %902 = vmatmul.bf16.vlgmr.msra.gmra.mxu1 %v4372_v55  ;;  %930 = vmatmul.bf16.vlgmr.msra.gmra.mxu3 %v4372_v55  ;;  %v3990_v13 = vld [vmem:[#allocation5 + $0x324] sm:$0xf0]  ;;  %v2987_v15 = vld [vmem:[#allocation5 + $0x128] sm:$0xf0]  ;;  %v3951_v5 = vld [vmem:[#allocation5 + $0x1ec] sm:$0xf0] }
  0x3a   :  { %950 = vmatpush.bf16.msrb.mxu1 %v3338_v45  ;;  %978 = vmatpush.bf16.msrb.mxu3 %v3342_v50  ;;  %v3986_v16 = vld [vmem:[#allocation5 + $0x30c] sm:$0xf]  ;;  %v3242_v19 = vor.u32 %v3990_v13, %v3241_v11  ;;  %v2990_v20 = vor.u32 %v3922_v14, %v2987_v15  ;;  %v2953_v21 = vld [vmem:[#allocation5 + $0xc8] sm:$0xf]  ;;  %v3947_v9 = vld [vmem:[#allocation5 + $0x1d4] sm:$0xf] }
  0x3b   :  { %v3243_v17 = vld [vmem:[#allocation5 + $0x328] sm:$0xf0]  ;;  %v3918_v22 = vld [vmem:[#allocation5 + $0xe4] sm:$0xf0]  ;;  %v3091_v10 = vld [vmem:[#allocation5 + $0x1f0] sm:$0xf0] }
  0x3c   :  { %937 = vmatpush.bf16.msrb.mxu0 %v3050_v58  ;;  %965 = vmatpush.bf16.msrb.mxu2 %v3054_v60  ;;  %v3209_v23 = vld [vmem:[#allocation5 + $0x2c8] sm:$0xf]  ;;  %v3246_v24 = vor.u32 %v3986_v16, %v3243_v17  ;;  %v3914_v26 = vld [vmem:[#allocation5 + $0xcc] sm:$0xf]  ;;  %v2954_v30 = vor.u32 %v3918_v22, %v2953_v21  ;;  %v4011_v13 = vld [vmem:[#allocation5 + $0x3d4] sm:$0xf]  ;;  %v3090_v16 = vor.u32 %v3951_v5, %v3089_v4 }
  0x3d   :  { %v3982_v25 = vld [vmem:[#allocation5 + $0x2e4] sm:$0xf0]  ;;  %v2955_v27 = vld [vmem:[#allocation5 + $0xe8] sm:$0xf0]  ;;  %v3347_v14 = vld [vmem:[#allocation5 + $0x3f0] sm:$0xf0] }
  0x3e   :  { %951 = vmatpush.bf16.msrb.mxu1 %v3306_v59  ;;  %979 = vmatpush.bf16.msrb.mxu3 %v3310_v0  ;;  %v3978_v28 = vld [vmem:[#allocation5 + $0x2cc] sm:$0xf]  ;;  %v3210_v31 = vor.u32 %v3982_v25, %v3209_v23  ;;  %v2958_v32 = vor.u32 %v3914_v26, %v2955_v27  ;;  %v2921_v33 = vld [vmem:[#allocation5 + $0x88] sm:$0xf]  ;;  %v3313_v21 = vld [vmem:[#allocation5 + $0x390] sm:$0xf]  ;;  %v3350_v22 = vor.u32 %v4011_v13, %v3347_v14 }
  0x3f   :  { %v3211_v29 = vld [vmem:[#allocation5 + $0x2e8] sm:$0xf0]  ;;  %v3910_v34 = vld [vmem:[#allocation5 + $0xa4] sm:$0xf0]  ;;  %v4007_v23 = vld [vmem:[#allocation5 + $0x3ac] sm:$0xf0] }
  0x40   :  { %938 = vmatpush.bf16.msrb.mxu0 %v3018_v6  ;;  %966 = vmatpush.bf16.msrb.mxu2 %v3022_v8  ;;  %v3177_v35 = vld [vmem:[#allocation5 + $0x288] sm:$0xf]  ;;  %v3214_v36 = vor.u32 %v3978_v28, %v3211_v29  ;;  %v3906_v38 = vld [vmem:[#allocation5 + $0x8c] sm:$0xf]  ;;  %v2922_v42 = vor.u32 %v3910_v34, %v2921_v33  ;;  %v3345_v6 = vld [vmem:[#allocation5 + $0x3d0] sm:$0xf]  ;;  %v3314_v29 = vor.u32 %v4007_v23, %v3313_v21 }
  0x41   :  { %v3974_v37 = vld [vmem:[#allocation5 + $0x2a4] sm:$0xf0]  ;;  %v2923_v39 = vld [vmem:[#allocation5 + $0xa8] sm:$0xf0]  ;;  %v4015_v8 = vld [vmem:[#allocation5 + $0x3ec] sm:$0xf0] }
  0x42   :  { %952 = vmatpush.bf16.msrb.mxu1 %v3274_v7  ;;  %980 = vmatpush.bf16.msrb.mxu3 %v3278_v12  ;;  %v3970_v40 = vld [vmem:[#allocation5 + $0x28c] sm:$0xf]  ;;  %v3178_v43 = vor.u32 %v3974_v37, %v3177_v35  ;;  %v2926_v44 = vor.u32 %v3906_v38, %v2923_v39  ;;  %v2889_v45 = vld [vmem:[#allocation5 + $0x48] sm:$0xf]  ;;  %v3346_v17 = vor.u32 %v4015_v8, %v3345_v6  ;;  %v3059_v25 = vld [vmem:[#allocation5 + $0x1b0] sm:$0xf0] }
  0x43   :  { %v3179_v41 = vld [vmem:[#allocation5 + $0x2a8] sm:$0xf0]  ;;  %v3902_v46 = vld [vmem:[#allocation5 + $0x64] sm:$0xf0]  ;;  %v4003_v26 = vld [vmem:[#allocation5 + $0x394] sm:$0xf] }
  0x44   :  { %939 = vmatpush.bf16.msrb.mxu0 %v2986_v18  ;;  %967 = vmatpush.bf16.msrb.mxu2 %v2990_v20  ;;  %v3145_v47 = vld [vmem:[#allocation5 + $0x248] sm:$0xf]  ;;  %v3182_v48 = vor.u32 %v3970_v40, %v3179_v41  ;;  %v3898_v50 = vld [vmem:[#allocation5 + $0x4c] sm:$0xf]  ;;  %v2890_v56 = vor.u32 %v3902_v46, %v2889_v45  ;;  %v3094_v18 = vor.u32 %v3947_v9, %v3091_v10  ;;  %v3943_v20 = vld [vmem:[#allocation5 + $0x1ac] sm:$0xf0] }
  0x45   :  { %v3966_v49 = vld [vmem:[#allocation5 + $0x264] sm:$0xf0]  ;;  %v2891_v52 = vld [vmem:[#allocation5 + $0x68] sm:$0xf0]  ;;  %v3315_v27 = vld [vmem:[#allocation5 + $0x3b0] sm:$0xf0] }
  0x46   :  { %953 = vmatpush.bf16.msrb.mxu1 %v3242_v19  ;;  %981 = vmatpush.bf16.msrb.mxu3 %v3246_v24  ;;  %v3962_v53 = vld [vmem:[#allocation5 + $0x24c] sm:$0xf]  ;;  %v2857_v57 = vld [vmem:[#allocation5 + $0x8] sm:$0xf]  ;;  %v3146_v59 = vor.u32 %v3966_v49, %v3145_v47  ;;  %v2894_v60 = vor.u32 %v3898_v50, %v2891_v52  ;;  %v3057_v19 = vld [vmem:[#allocation5 + $0x190] sm:$0xf]  ;;  %v3318_v34 = vor.u32 %v4003_v26, %v3315_v27 }
  0x47   :  { %v3147_v54 = vld [vmem:[#allocation5 + $0x268] sm:$0xf0]  ;;  %v3894_v58 = vld [vmem:[#allocation5 + $0x24] sm:$0xf0]  ;;  %v3939_v24 = vld [vmem:[#allocation5 + $0x194] sm:$0xf]  ;;  %v3058_v28 = vor.u32 %v3943_v20, %v3057_v19 }
  0x48   :  { %940 = vmatpush.bf16.msrb.mxu0 %v2954_v30  ;;  %968 = vmatpush.bf16.msrb.mxu2 %v2958_v32  ;;  %v3113_v61 = vld [vmem:[#allocation5 + $0x208] sm:$0xf]  ;;  %v3890_v63 = vld [vmem:[#allocation5 + $0xc] sm:$0xf]  ;;  %v3150_v0 = vor.u32 %v3962_v53, %v3147_v54  ;;  %v2858_v7 = vor.u32 %v3894_v58, %v2857_v57  ;;  %v3062_v30 = vor.u32 %v3939_v24, %v3059_v25  ;;  %v3935_v32 = vld [vmem:[#allocation5 + $0x16c] sm:$0xf0] }
  0x49   :  { %v3958_v62 = vld [vmem:[#allocation5 + $0x224] sm:$0xf0]  ;;  %v2859_v1 = vld [vmem:[#allocation5 + $0x28] sm:$0xf0]  ;;  %v3281_v33 = vld [vmem:[#allocation5 + $0x350] sm:$0xf] }
  0x4a   :  { %954 = vmatpush.bf16.msrb.mxu1 %v3210_v31  ;;  %982 = vmatpush.bf16.msrb.mxu3 %v3214_v36  ;;  %v3954_v2 = vld [vmem:[#allocation5 + $0x20c] sm:$0xf]  ;;  %v3114_v11 = vor.u32 %v3958_v62, %v3113_v61  ;;  %v2862_v12 = vor.u32 %v3890_v63, %v2859_v1  ;;  %v3025_v31 = vld [vmem:[#allocation5 + $0x150] sm:$0xf]  ;;  %v3931_v36 = vld [vmem:[#allocation5 + $0x154] sm:$0xf] }
  0x4b   :  { %v3115_v3 = vld [vmem:[#allocation5 + $0x228] sm:$0xf0]  ;;  %v3999_v35 = vld [vmem:[#allocation5 + $0x36c] sm:$0xf0]  ;;  %v3027_v37 = vld [vmem:[#allocation5 + $0x170] sm:$0xf0]  ;;  %v3026_v40 = vor.u32 %v3935_v32, %v3025_v31 }
  0x4c   :  { %941 = vmatpush.bf16.msrb.mxu0 %v2922_v42  ;;  %969 = vmatpush.bf16.msrb.mxu2 %v2926_v44  ;;  %v3118_v15 = vor.u32 %v3954_v2, %v3115_v3  ;;  %v3995_v38 = vld [vmem:[#allocation5 + $0x354] sm:$0xf]  ;;  %v3282_v41 = vor.u32 %v3999_v35, %v3281_v33  ;;  %v3030_v42 = vor.u32 %v3931_v36, %v3027_v37  ;;  %v3927_v44 = vld [vmem:[#allocation5 + $0x12c] sm:$0xf0] }
  0x4d   :  { %v3283_v39 = vld [vmem:[#allocation5 + $0x370] sm:$0xf0]  ;;  %v3249_v45 = vld [vmem:[#allocation5 + $0x310] sm:$0xf] }
  0x4e   :  { %955 = vmatpush.bf16.msrb.mxu1 %v3178_v43  ;;  %983 = vmatpush.bf16.msrb.mxu3 %v3182_v48  ;;  %v2993_v43 = vld [vmem:[#allocation5 + $0x110] sm:$0xf]  ;;  %v3286_v46 = vor.u32 %v3995_v38, %v3283_v39  ;;  %v3923_v48 = vld [vmem:[#allocation5 + $0x114] sm:$0xf]  ;;  %v3097_v38 = vld [vmem:[#allocation5 + $0x1d8] sm:$0xf] }
  0x4f   :  { %v3991_v47 = vld [vmem:[#allocation5 + $0x32c] sm:$0xf0]  ;;  %v2995_v49 = vld [vmem:[#allocation5 + $0x130] sm:$0xf0]  ;;  %v2994_v53 = vor.u32 %v3927_v44, %v2993_v43  ;;  %v3952_v39 = vld [vmem:[#allocation5 + $0x1f4] sm:$0xf0] }
  0x50   :  { %942 = vmatpush.bf16.msrb.mxu0 %v2890_v56  ;;  %970 = vmatpush.bf16.msrb.mxu2 %v2894_v60  ;;  %v3987_v50 = vld [vmem:[#allocation5 + $0x314] sm:$0xf]  ;;  %v3250_v54 = vor.u32 %v3991_v47, %v3249_v45  ;;  %v2998_v56 = vor.u32 %v3923_v48, %v2995_v49  ;;  %v2961_v57 = vld [vmem:[#allocation5 + $0xd0] sm:$0xf]  ;;  %v3948_v43 = vld [vmem:[#allocation5 + $0x1dc] sm:$0xf] }
  0x51   :  { %v3251_v52 = vld [vmem:[#allocation5 + $0x330] sm:$0xf0]  ;;  %v3919_v58 = vld [vmem:[#allocation5 + $0xec] sm:$0xf0]  ;;  %v3099_v44 = vld [vmem:[#allocation5 + $0x1f8] sm:$0xf0] }
  0x52   :  { %956 = vmatpush.bf16.msrb.mxu1 %v3146_v59  ;;  %984 = vmatpush.bf16.msrb.mxu3 %v3150_v0  ;;  %v3217_v59 = vld [vmem:[#allocation5 + $0x2d0] sm:$0xf]  ;;  %v3254_v60 = vor.u32 %v3987_v50, %v3251_v52  ;;  %v3915_v62 = vld [vmem:[#allocation5 + $0xd4] sm:$0xf]  ;;  %v2962_v2 = vor.u32 %v3919_v58, %v2961_v57  ;;  %v4012_v47 = vld [vmem:[#allocation5 + $0x3dc] sm:$0xf]  ;;  %v3098_v50 = vor.u32 %v3952_v39, %v3097_v38 }
  0x53   :  { %v3983_v61 = vld [vmem:[#allocation5 + $0x2ec] sm:$0xf0]  ;;  %v2963_v63 = vld [vmem:[#allocation5 + $0xf0] sm:$0xf0]  ;;  %v3355_v48 = vld [vmem:[#allocation5 + $0x3f8] sm:$0xf0] }
  0x54   :  { %943 = vmatpush.bf16.msrb.mxu0 %v2858_v7  ;;  %971 = vmatpush.bf16.msrb.mxu2 %v2862_v12  ;;  %v3979_v0 = vld [vmem:[#allocation5 + $0x2d4] sm:$0xf]  ;;  %v3218_v3 = vor.u32 %v3983_v61, %v3217_v59  ;;  %v2966_v4 = vor.u32 %v3915_v62, %v2963_v63  ;;  %v2929_v5 = vld [vmem:[#allocation5 + $0x90] sm:$0xf]  ;;  %v3321_v57 = vld [vmem:[#allocation5 + $0x398] sm:$0xf]  ;;  %v3358_v58 = vor.u32 %v4012_v47, %v3355_v48 }
  0x55   :  { %v3219_v1 = vld [vmem:[#allocation5 + $0x2f0] sm:$0xf0]  ;;  %v3911_v6 = vld [vmem:[#allocation5 + $0xac] sm:$0xf0]  ;;  %v4008_v59 = vld [vmem:[#allocation5 + $0x3b4] sm:$0xf0] }
  0x56   :  { %957 = vmatpush.bf16.msrb.mxu1 %v3114_v11  ;;  %985 = vmatpush.bf16.msrb.mxu3 %v3118_v15  ;;  %v3185_v7 = vld [vmem:[#allocation5 + $0x290] sm:$0xf]  ;;  %v3222_v8 = vor.u32 %v3979_v0, %v3219_v1  ;;  %v3907_v10 = vld [vmem:[#allocation5 + $0x94] sm:$0xf]  ;;  %v2930_v14 = vor.u32 %v3911_v6, %v2929_v5  ;;  %v3067_v61 = vld [vmem:[#allocation5 + $0x1b8] sm:$0xf0]  ;;  %v3322_v1 = vor.u32 %v4008_v59, %v3321_v57 }
  0x57   :  { %944 = vmatmul.bf16.vlgmr.msrb.gmra.mxu0 %v4370_v51  ;;  %972 = vmatmul.bf16.vlgmr.msrb.gmra.mxu2 %v4370_v51  ;;  %v3975_v9 = vld [vmem:[#allocation5 + $0x2ac] sm:$0xf0]  ;;  %v2931_v11 = vld [vmem:[#allocation5 + $0xb0] sm:$0xf0]  ;;  %v4004_v62 = vld [vmem:[#allocation5 + $0x39c] sm:$0xf] }
  0x58   :  { %992 = vmatpush.bf16.msra.mxu0 %v3090_v16  ;;  %1020 = vmatpush.bf16.msra.mxu2 %v3094_v18  ;;  %v3971_v12 = vld [vmem:[#allocation5 + $0x294] sm:$0xf]  ;;  %v3186_v15 = vor.u32 %v3975_v9, %v3185_v7  ;;  %v2934_v16 = vor.u32 %v3907_v10, %v2931_v11  ;;  %v3903_v18 = vld [vmem:[#allocation5 + $0x6c] sm:$0xf0]  ;;  %v3323_v63 = vld [vmem:[#allocation5 + $0x3b8] sm:$0xf0] }
  0x59   :  { %958 = vmatmul.bf16.vlgmr.msrb.gmra.mxu1 %v4372_v55  ;;  %986 = vmatmul.bf16.vlgmr.msrb.gmra.mxu3 %v4372_v55  ;;  %v3187_v13 = vld [vmem:[#allocation5 + $0x2b0] sm:$0xf0]  ;;  %v3153_v19 = vld [vmem:[#allocation5 + $0x250] sm:$0xf]  ;;  %v3289_v5 = vld [vmem:[#allocation5 + $0x358] sm:$0xf]  ;;  %v3326_v6 = vor.u32 %v4004_v62, %v3323_v63 }
  0x5a   :  { %1006 = vmatpush.bf16.msra.mxu1 %v3346_v17  ;;  %1034 = vmatpush.bf16.msra.mxu3 %v3350_v22  ;;  %v2897_v17 = vld [vmem:[#allocation5 + $0x50] sm:$0xf]  ;;  %v3190_v20 = vor.u32 %v3971_v12, %v3187_v13  ;;  %v3899_v22 = vld [vmem:[#allocation5 + $0x54] sm:$0xf]  ;;  %v4000_v7 = vld [vmem:[#allocation5 + $0x374] sm:$0xf0] }
  0x5b   :  { %v3967_v21 = vld [vmem:[#allocation5 + $0x26c] sm:$0xf0]  ;;  %v2899_v23 = vld [vmem:[#allocation5 + $0x70] sm:$0xf0]  ;;  %v2898_v26 = vor.u32 %v3903_v18, %v2897_v17  ;;  %v3035_v9 = vld [vmem:[#allocation5 + $0x178] sm:$0xf0]  ;;  %v3290_v13 = vor.u32 %v4000_v7, %v3289_v5 }
  0x5c   :  { %993 = vmatpush.bf16.msra.mxu0 %v3058_v28  ;;  %1021 = vmatpush.bf16.msra.mxu2 %v3062_v30  ;;  %v3963_v24 = vld [vmem:[#allocation5 + $0x254] sm:$0xf]  ;;  %v2865_v27 = vld [vmem:[#allocation5 + $0x10] sm:$0xf]  ;;  %v2902_v30 = vor.u32 %v3899_v22, %v2899_v23  ;;  %v3996_v10 = vld [vmem:[#allocation5 + $0x35c] sm:$0xf] }
  0x5d   :  { %v3155_v25 = vld [vmem:[#allocation5 + $0x270] sm:$0xf0]  ;;  %v3895_v28 = vld [vmem:[#allocation5 + $0x2c] sm:$0xf0]  ;;  %v3291_v11 = vld [vmem:[#allocation5 + $0x378] sm:$0xf0] }
  0x5e   :  { %1007 = vmatpush.bf16.msra.mxu1 %v3314_v29  ;;  %1035 = vmatpush.bf16.msra.mxu3 %v3318_v34  ;;  %v3154_v29 = vor.u32 %v3967_v21, %v3153_v19  ;;  %v3121_v31 = vld [vmem:[#allocation5 + $0x210] sm:$0xf]  ;;  %v3891_v33 = vld [vmem:[#allocation5 + $0x14] sm:$0xf]  ;;  %v3158_v34 = vor.u32 %v3963_v24, %v3155_v25  ;;  %v3257_v17 = vld [vmem:[#allocation5 + $0x318] sm:$0xf]  ;;  %v3294_v18 = vor.u32 %v3996_v10, %v3291_v11 }
  0x5f   :  { %v3959_v32 = vld [vmem:[#allocation5 + $0x22c] sm:$0xf0]  ;;  %v2867_v35 = vld [vmem:[#allocation5 + $0x30] sm:$0xf0]  ;;  %v3992_v19 = vld [vmem:[#allocation5 + $0x334] sm:$0xf0] }
  0x60   :  { %994 = vmatpush.bf16.msra.mxu0 %v3026_v40  ;;  %1022 = vmatpush.bf16.msra.mxu2 %v3030_v42  ;;  %v3955_v36 = vld [vmem:[#allocation5 + $0x214] sm:$0xf]  ;;  %v3353_v40 = vld [vmem:[#allocation5 + $0x3d8] sm:$0xf]  ;;  %v3122_v45 = vor.u32 %v3959_v32, %v3121_v31  ;;  %v3003_v21 = vld [vmem:[#allocation5 + $0x138] sm:$0xf0]  ;;  %v3258_v25 = vor.u32 %v3992_v19, %v3257_v17 }
  0x61   :  { %v3123_v37 = vld [vmem:[#allocation5 + $0x230] sm:$0xf0]  ;;  %v4016_v42 = vld [vmem:[#allocation5 + $0x3f4] sm:$0xf0]  ;;  %v3988_v22 = vld [vmem:[#allocation5 + $0x31c] sm:$0xf] }
  0x62   :  { %1008 = vmatpush.bf16.msra.mxu1 %v3282_v41  ;;  %1036 = vmatpush.bf16.msra.mxu3 %v3286_v46  ;;  %v2866_v41 = vor.u32 %v3895_v28, %v2865_v27  ;;  %v2870_v46 = vor.u32 %v3891_v33, %v2867_v35  ;;  %v3126_v49 = vor.u32 %v3955_v36, %v3123_v37  ;;  %v3259_v23 = vld [vmem:[#allocation5 + $0x338] sm:$0xf0]  ;;  %v2969_v27 = vld [vmem:[#allocation5 + $0xd8] sm:$0xf] }
  0x63   :  { %v3354_v52 = vor.u32 %v4016_v42, %v3353_v40  ;;  %v3920_v28 = vld [vmem:[#allocation5 + $0xf4] sm:$0xf0]  ;;  %v3916_v32 = vld [vmem:[#allocation5 + $0xdc] sm:$0xf] }
  0x64   :  { %995 = vmatpush.bf16.msra.mxu0 %v2994_v53  ;;  %1023 = vmatpush.bf16.msra.mxu2 %v2998_v56  ;;  %v3102_v53 = vor.u32 %v3948_v43, %v3099_v44  ;;  %v3944_v56 = vld [vmem:[#allocation5 + $0x1b4] sm:$0xf0]  ;;  %v2971_v33 = vld [vmem:[#allocation5 + $0xf8] sm:$0xf0]  ;;  %v2970_v36 = vor.u32 %v3920_v28, %v2969_v27 }
  0x65   :  { %v3984_v31 = vld [vmem:[#allocation5 + $0x2f4] sm:$0xf0]  ;;  %v3227_v35 = vld [vmem:[#allocation5 + $0x2f8] sm:$0xf0]  ;;  %v2974_v38 = vor.u32 %v3916_v32, %v2971_v33 }
  0x66   :  { %1009 = vmatpush.bf16.msra.mxu1 %v3250_v54  ;;  %1037 = vmatpush.bf16.msra.mxu3 %v3254_v60  ;;  %v3065_v54 = vld [vmem:[#allocation5 + $0x198] sm:$0xf]  ;;  %v3940_v60 = vld [vmem:[#allocation5 + $0x19c] sm:$0xf] }
  0x67   :  { %v3066_v0 = vor.u32 %v3944_v56, %v3065_v54  ;;  %v2937_v39 = vld [vmem:[#allocation5 + $0x98] sm:$0xf]  ;;  %v3908_v44 = vld [vmem:[#allocation5 + $0x9c] sm:$0xf] }
  0x68   :  { %996 = vmatpush.bf16.msra.mxu0 %v2962_v2  ;;  %1024 = vmatpush.bf16.msra.mxu2 %v2966_v4  ;;  %v3070_v2 = vor.u32 %v3940_v60, %v3067_v61  ;;  %v3936_v4 = vld [vmem:[#allocation5 + $0x174] sm:$0xf0]  ;;  %v3195_v47 = vld [vmem:[#allocation5 + $0x2b8] sm:$0xf0] }
  0x69   :  { %v3912_v40 = vld [vmem:[#allocation5 + $0xb4] sm:$0xf0]  ;;  %v2907_v59 = vld [vmem:[#allocation5 + $0x78] sm:$0xf0] }
  0x6a   :  { %1010 = vmatpush.bf16.msra.mxu1 %v3218_v3  ;;  %1038 = vmatpush.bf16.msra.mxu3 %v3222_v8  ;;  %v3033_v3 = vld [vmem:[#allocation5 + $0x158] sm:$0xf]  ;;  %v3932_v8 = vld [vmem:[#allocation5 + $0x15c] sm:$0xf]  ;;  %v2938_v48 = vor.u32 %v3912_v40, %v2937_v39 }
  0x6b   :  { %v3034_v12 = vor.u32 %v3936_v4, %v3033_v3  ;;  %v3976_v43 = vld [vmem:[#allocation5 + $0x2b4] sm:$0xf0]  ;;  %v3964_v60 = vld [vmem:[#allocation5 + $0x25c] sm:$0xf] }
  0x6c   :  { %997 = vmatpush.bf16.msra.mxu0 %v2930_v14  ;;  %1025 = vmatpush.bf16.msra.mxu2 %v2934_v16  ;;  %v3038_v14 = vor.u32 %v3932_v8, %v3035_v9  ;;  %v3928_v16 = vld [vmem:[#allocation5 + $0x134] sm:$0xf0]  ;;  %v3163_v61 = vld [vmem:[#allocation5 + $0x278] sm:$0xf0] }
  0x6d   :  { %v3161_v54 = vld [vmem:[#allocation5 + $0x258] sm:$0xf]  ;;  %v3166_v4 = vor.u32 %v3964_v60, %v3163_v61  ;;  %v2875_v7 = vld [vmem:[#allocation5 + $0x38] sm:$0xf0] }
  0x6e   :  { %1011 = vmatpush.bf16.msra.mxu1 %v3186_v15  ;;  %1039 = vmatpush.bf16.msra.mxu3 %v3190_v20  ;;  %v3001_v15 = vld [vmem:[#allocation5 + $0x118] sm:$0xf]  ;;  %v3924_v20 = vld [vmem:[#allocation5 + $0x11c] sm:$0xf] }
  0x6f   :  { %v3002_v24 = vor.u32 %v3928_v16, %v3001_v15  ;;  %v3968_v57 = vld [vmem:[#allocation5 + $0x274] sm:$0xf0]  ;;  %v3956_v8 = vld [vmem:[#allocation5 + $0x21c] sm:$0xf] }
  0x70   :  { %998 = vmatpush.bf16.msra.mxu0 %v2898_v26  ;;  %1026 = vmatpush.bf16.msra.mxu2 %v2902_v30  ;;  %v3006_v26 = vor.u32 %v3924_v20, %v3003_v21  ;;  %v3262_v30 = vor.u32 %v3988_v22, %v3259_v23  ;;  %v3162_v63 = vor.u32 %v3968_v57, %v3161_v54  ;;  %v3129_v3 = vld [vmem:[#allocation5 + $0x218] sm:$0xf]  ;;  %v3131_v9 = vld [vmem:[#allocation5 + $0x238] sm:$0xf0] }
  0x71   :  { %v3960_v5 = vld [vmem:[#allocation5 + $0x234] sm:$0xf0] }
  0x72   :  { %1012 = vmatpush.bf16.msra.mxu1 %v3154_v29  ;;  %1040 = vmatpush.bf16.msra.mxu3 %v3158_v34  ;;  %v3225_v29 = vld [vmem:[#allocation5 + $0x2d8] sm:$0xf]  ;;  %v3980_v34 = vld [vmem:[#allocation5 + $0x2dc] sm:$0xf]  ;;  %v3130_v11 = vor.u32 %v3960_v5, %v3129_v3 }
  0x73   :  { %v3226_v37 = vor.u32 %v3984_v31, %v3225_v29  ;;  %v3230_v42 = vor.u32 %v3980_v34, %v3227_v35  ;;  %v3433_v32 = vld [vmem:[#allocation8 + $0x70] sm:$0xf]  ;;  %v4032_v34 = vld [vmem:[#allocation8 + $0x74] sm:$0xf0] }
  0x74   :  { %999 = vmatpush.bf16.msra.mxu0 %v2866_v41  ;;  %1027 = vmatpush.bf16.msra.mxu2 %v2870_v46  ;;  %v3193_v41 = vld [vmem:[#allocation5 + $0x298] sm:$0xf]  ;;  %v3972_v46 = vld [vmem:[#allocation5 + $0x29c] sm:$0xf]  ;;  %v3434_v39 = vor.u32 %v4032_v34, %v3433_v32 }
  0x75   :  { %v3198_v56 = vor.u32 %v3972_v46, %v3195_v47 }
  0x76   :  { %1013 = vmatpush.bf16.msra.mxu1 %v3122_v45  ;;  %1041 = vmatpush.bf16.msra.mxu3 %v3126_v49  ;;  %v2939_v45 = vld [vmem:[#allocation5 + $0xb8] sm:$0xf0]  ;;  %v3194_v49 = vor.u32 %v3976_v43, %v3193_v41 }
  0x77   :  { %1000 = vmatmul.bf16.vlgmr.msra.gmra.mxu0 %v4370_v51  ;;  %1028 = vmatmul.bf16.vlgmr.msra.gmra.mxu2 %v4370_v51 }
  0x78   :  { %1048 = vmatpush.bf16.msrb.mxu0 %v3098_v50  ;;  %1076 = vmatpush.bf16.msrb.mxu2 %v3102_v53  ;;  %v2942_v50 = vor.u32 %v3908_v44, %v2939_v45  ;;  %v3904_v53 = vld [vmem:[#allocation5 + $0x74] sm:$0xf0] }
  0x79   :  { %1014 = vmatmul.bf16.vlgmr.msra.gmra.mxu1 %v4372_v55  ;;  %1042 = vmatmul.bf16.vlgmr.msra.gmra.mxu3 %v4372_v55 }
  0x7a   :  { %1062 = vmatpush.bf16.msrb.mxu1 %v3354_v52  ;;  %1090 = vmatpush.bf16.msrb.mxu3 %v3358_v58  ;;  %v2905_v52 = vld [vmem:[#allocation5 + $0x58] sm:$0xf]  ;;  %v3900_v58 = vld [vmem:[#allocation5 + $0x5c] sm:$0xf] }
  0x7b   :  { %v2906_v62 = vor.u32 %v3904_v53, %v2905_v52 }
  0x7c   :  { %1049 = vmatpush.bf16.msrb.mxu0 %v3066_v0  ;;  %1077 = vmatpush.bf16.msrb.mxu2 %v3070_v2  ;;  %v2910_v0 = vor.u32 %v3900_v58, %v2907_v59  ;;  %v3896_v2 = vld [vmem:[#allocation5 + $0x34] sm:$0xf0] }
  0x7e   :  { %1063 = vmatpush.bf16.msrb.mxu1 %v3322_v1  ;;  %1091 = vmatpush.bf16.msrb.mxu3 %v3326_v6  ;;  %v2873_v1 = vld [vmem:[#allocation5 + $0x18] sm:$0xf]  ;;  %v3892_v6 = vld [vmem:[#allocation5 + $0x1c] sm:$0xf] }
  0x7f   :  { %v2874_v10 = vor.u32 %v3896_v2, %v2873_v1 }
  0x80   :  { %1050 = vmatpush.bf16.msrb.mxu0 %v3034_v12  ;;  %1078 = vmatpush.bf16.msrb.mxu2 %v3038_v14  ;;  %v2878_v12 = vor.u32 %v3892_v6, %v2875_v7  ;;  %v4390_v14 = vld [vmem:[#allocation7] sm:$0xff] }
  0x81   :  { %v214_v15 = vperm.slane %v4390_v14, 0  ;;  %v215_v20 = vperm.slane %v4390_v14, 1 }
  0x82   :  { %1064 = vmatpush.bf16.msrb.mxu1 %v3290_v13  ;;  %1092 = vmatpush.bf16.msrb.mxu3 %v3294_v18  ;;  %v3134_v13 = vor.u32 %v3956_v8, %v3131_v9 }
  0x84   :  { %1051 = vmatpush.bf16.msrb.mxu0 %v3002_v24  ;;  %1079 = vmatpush.bf16.msrb.mxu2 %v3006_v26 }
  0x86   :  { %1065 = vmatpush.bf16.msrb.mxu1 %v3258_v25  ;;  %1093 = vmatpush.bf16.msrb.mxu3 %v3262_v30 }
  0x88   :  { %1052 = vmatpush.bf16.msrb.mxu0 %v2970_v36  ;;  %1080 = vmatpush.bf16.msrb.mxu2 %v2974_v38 }
  0x8a   :  { %1066 = vmatpush.bf16.msrb.mxu1 %v3226_v37  ;;  %1094 = vmatpush.bf16.msrb.mxu3 %v3230_v42 }
  0x8c   :  { %1053 = vmatpush.bf16.msrb.mxu0 %v2938_v48  ;;  %1081 = vmatpush.bf16.msrb.mxu2 %v2942_v50 }
  0x8e   :  { %1067 = vmatpush.bf16.msrb.mxu1 %v3194_v49  ;;  %1095 = vmatpush.bf16.msrb.mxu3 %v3198_v56 }
  0x90   :  { %1054 = vmatpush.bf16.msrb.mxu0 %v2906_v62  ;;  %1082 = vmatpush.bf16.msrb.mxu2 %v2910_v0 }
  0x92   :  { %1068 = vmatpush.bf16.msrb.mxu1 %v3162_v63  ;;  %1096 = vmatpush.bf16.msrb.mxu3 %v3166_v4 }
  0x94   :  { %1055 = vmatpush.bf16.msrb.mxu0 %v2874_v10  ;;  %1083 = vmatpush.bf16.msrb.mxu2 %v2878_v12 }
  0x96   :  { %1069 = vmatpush.bf16.msrb.mxu1 %v3130_v11  ;;  %1097 = vmatpush.bf16.msrb.mxu3 %v3134_v13 }
  0x97   :  { %1056 = vmatmul.bf16.vlgmr.msrb.gmra.mxu0 %v4370_v51  ;;  %1084 = vmatmul.bf16.vlgmr.msrb.gmra.mxu2 %v4370_v51 }
  0x98   :  { %2590 = vmatpush.bf16.msra.mxu0 %v3434_v39 }
  0x99   :  { %1070 = vmatmul.bf16.vlgmr.msrb.gmra.mxu1 %v4372_v55  ;;  %1098 = vmatmul.bf16.vlgmr.msrb.gmra.mxu3 %v4372_v55 }
  0xb4   :  { %v889_v16 = vpop.f32.mrf.mxu0 }
  0xb5   :  { %v890_v17 = vadd.f32 %v889_v16, %v214_v15 }
  0xb6   :  { %v903_v18 = vpop.f32.mrf.mxu1 }
  0xb7   :  { %v4393_v19 = vadd.f32 %v903_v18, %v890_v17 }
  0xb9   :  { %v4397_v21 = vmul.f32 0.70710677, %v4393_v19 }
  0xba   :  { %v917_v51 = vpop.f32.mrf.mxu2 }
  0xbb   :  { %v1136_v22 = vmul.f32 %v4397_v21, %v4397_v21  ;;  %v918_v23 = vadd.f32 %v917_v51, %v215_v20 }
  0xbc   :  { %v891_v55 = vpop.f32.mrf.mxu0  ;;  %v931_v24 = vpop.f32.mrf.mxu3 }
  0xbd   :  { %v4401_v25 = vmin.f32 %v1136_v22, 16.0  ;;  %v892_v26 = vadd.f32 %v891_v55, %v214_v15  ;;  %v4403_v28 = vadd.f32 %v931_v24, %v918_v23 }
  0xbe   :  { %v905_v27 = vpop.f32.mrf.mxu1 }
  0xbf   :  { %v1138_v29 = vmul.f32 2.1237322e-06, %v4401_v25  ;;  %v1149_v30 = vmul.f32 3.8918573e-05, %v4401_v25  ;;  %v4407_v31 = vadd.f32 %v905_v27, %v892_v26  ;;  %v4410_v33 = vmul.f32 0.70710677, %v4403_v28 }
  0xc0   :  { %v216_v26 = vperm.slane %v4390_v14, 2 }
  0xc1   :  { %v1139_v35 = vadd.f32 0.00028619796, %v1138_v29  ;;  %v1150_v36 = vadd.f32 0.001143296, %v1149_v30  ;;  %v1176_v37 = vmul.f32 %v4410_v33, %v4410_v33  ;;  %v4415_v38 = vmul.f32 0.70710677, %v4407_v31 }
  0xc2   :  { %v919_v42 = vpop.f32.mrf.mxu2 }
  0xc3   :  { %v1140_v40 = vmul.f32 %v1139_v35, %v4401_v25  ;;  %v1151_v41 = vmul.f32 %v1150_v36, %v4401_v25  ;;  %v4419_v43 = vmin.f32 %v1176_v37, 16.0  ;;  %v1456_v44 = vmul.f32 %v4415_v38, %v4415_v38  ;;  %v3425_v35 = vld [vmem:[#allocation8 + $0x60] sm:$0xf] }
  0xc4   :  { %v920_v45 = vadd.f32 %v919_v42, %v215_v20  ;;  %v933_v46 = vpop.f32.mrf.mxu3 }
  0xc5   :  { %v1141_v47 = vadd.f32 0.0036580483, %v1140_v40  ;;  %v1152_v48 = vadd.f32 0.014752088, %v1151_v41  ;;  %v1178_v49 = vmul.f32 2.1237322e-06, %v4419_v43 }
  0xc6   :  { %v1189_v50 = vmul.f32 3.8918573e-05, %v4419_v43  ;;  %v4425_v52 = vmin.f32 %v1456_v44, 16.0  ;;  %v4429_v56 = vadd.f32 %v933_v46, %v920_v45  ;;  %v4030_v45 = vld [vmem:[#allocation8 + $0x64] sm:$0xf0]  ;;  %v4462_v46 = vmul.f32 0.5, %v4393_v19 }
  0xc7   :  { %v1142_v53 = vmul.f32 %v1141_v47, %v4401_v25  ;;  %v1153_v54 = vmul.f32 %v1152_v48, %v4401_v25  ;;  %v1179_v57 = vadd.f32 0.00028619796, %v1178_v49 }
  0xc8   :  { %v1190_v58 = vadd.f32 0.001143296, %v1189_v50  ;;  %v1458_v59 = vmul.f32 2.1237322e-06, %v4425_v52  ;;  %v1469_v61 = vmul.f32 3.8918573e-05, %v4425_v52 }
  0xc9   :  { %v1154_v60 = vadd.f32 0.112945676, %v1153_v54  ;;  %v1143_v62 = vadd.f32 0.05243302, %v1142_v53  ;;  %v1180_v63 = vmul.f32 %v1179_v57, %v4419_v43  ;;  %v4437_v4 = vmul.f32 0.70710677, %v4429_v56 }
  0xca   :  { %v1191_v0 = vmul.f32 %v1190_v58, %v4419_v43  ;;  %v1459_v1 = vadd.f32 0.00028619796, %v1458_v59  ;;  %v1470_v3 = vadd.f32 0.001143296, %v1469_v61 }
  0xcb   :  { %v1155_v2 = vmul.f32 %v1154_v60, %v4401_v25  ;;  %v1181_v5 = vadd.f32 0.0036580483, %v1180_v63  ;;  %v1496_v10 = vmul.f32 %v4437_v4, %v4437_v4  ;;  %v1144_v11 = vmul.f32 %v1143_v62, %v4401_v25 }
  0xcc   :  { %v1192_v6 = vadd.f32 0.014752088, %v1191_v0  ;;  %v1460_v7 = vmul.f32 %v1459_v1, %v4425_v52  ;;  %v1471_v9 = vmul.f32 %v1470_v3, %v4425_v52  ;;  %v3426_v60 = vor.u32 %v4030_v45, %v3425_v35 }
  0xcd   :  { %v1156_v8 = vadd.f32 0.4994258, %v1155_v2  ;;  %v1182_v12 = vmul.f32 %v1181_v5, %v4419_v43  ;;  %v4447_v18 = vmin.f32 %v1496_v10, 16.0  ;;  %v1145_v27 = vadd.f32 0.18741608, %v1144_v11 }
  0xce   :  { %v1193_v13 = vmul.f32 %v1192_v6, %v4419_v43  ;;  %v1461_v15 = vadd.f32 0.0036580483, %v1460_v7  ;;  %v1472_v17 = vadd.f32 0.014752088, %v1471_v9  ;;  %v4480_v2 = vmul.f32 0.5, %v4403_v28  ;;  %2591 = vmatpush.bf16.msra.mxu0 %v3426_v60 }
  0xcf   :  { %v1157_v16 = vmul.f32 %v1156_v8, %v4401_v25  ;;  %v1183_v20 = vadd.f32 0.05243302, %v1182_v12  ;;  %v1498_v24 = vmul.f32 2.1237322e-06, %v4447_v18  ;;  %v1509_v34 = vmul.f32 3.8918573e-05, %v4447_v18 }
  0xd0   :  { %v1194_v22 = vadd.f32 0.112945676, %v1193_v13  ;;  %v1462_v51 = vmul.f32 %v1461_v15, %v4425_v52  ;;  %v1473_v55 = vmul.f32 %v1472_v17, %v4425_v52  ;;  %v1146_v47 = vmul.f32 %v1145_v27, %v4401_v25 }
  0xd1   :  { %v4450_v23 = vadd.f32 1.0, %v1157_v16  ;;  %v1184_v29 = vmul.f32 %v1183_v20, %v4419_v43  ;;  %v1499_v42 = vadd.f32 0.00028619796, %v1498_v24  ;;  %v1510_v53 = vadd.f32 0.001143296, %v1509_v34 }
  0xd2   :  { %v1195_v30 = vmul.f32 %v1194_v22, %v4419_v43  ;;  %v1463_v39 = vadd.f32 0.05243302, %v1462_v51  ;;  %v1474_v41 = vadd.f32 0.112945676, %v1473_v55  ;;  %v1147_v0 = vadd.f32 1.1283791, %v1146_v47 }
  0xd3   :  { %4156 = vrcp.f32 %v4450_v23  ;;  %v1185_v36 = vadd.f32 0.18741608, %v1184_v29  ;;  %v1500_v50 = vmul.f32 %v1499_v42, %v4447_v18  ;;  %v1511_v25 = vmul.f32 %v1510_v53, %v4447_v18 }
  0xd4   :  { %v945_v32 = vpop.f32.mrf.mxu0  ;;  %v1196_v37 = vadd.f32 0.4994258, %v1195_v30  ;;  %v1475_v49 = vmul.f32 %v1474_v41, %v4425_v52  ;;  %v1464_v59 = vmul.f32 %v1463_v39, %v4425_v52  ;;  %vm1164_vm0 = vweird.f32 %v4450_v23 }
  0xd5   :  { %v946_v44 = vadd.f32 %v945_v32, %v216_v26  ;;  %v1186_v57 = vmul.f32 %v1185_v36, %v4419_v43  ;;  %v1501_v62 = vadd.f32 0.0036580483, %v1500_v50  ;;  %v1170_v3 = vand.u32 2147483648, %v4450_v23 }
  0xd6   :  { %v959_v40 = vpop.f32.mrf.mxu1  ;;  %v1197_v48 = vmul.f32 %v1196_v37, %v4419_v43  ;;  %v1476_v61 = vadd.f32 0.4994258, %v1475_v49  ;;  %v1168_v43 = vand.u32 2147483647, %v4450_v23  ;;  %v1512_v8 = vadd.f32 0.014752088, %v1511_v25 }
  0xd7   :  { %v4468_v54 = vadd.f32 %v959_v40, %v946_v44  ;;  %v1502_v7 = vmul.f32 %v1501_v62, %v4447_v18  ;;  %v1187_v9 = vadd.f32 1.1283791, %v1186_v57  ;;  %v4489_v28 = vmul.f32 0.5, %v4407_v31 }
  0xd8   :  { %v4471_v58 = vadd.f32 1.0, %v1197_v48  ;;  %v1477_v6 = vmul.f32 %v1476_v61, %v4425_v52  ;;  %v1465_v10 = vadd.f32 0.18741608, %v1464_v59  ;;  %v1513_v16 = vmul.f32 %v1512_v8, %v4447_v18 }
  0xd9   :  { %v4157_v19 = vpop.eup %4156  ;;  %v4476_v63 = vmul.f32 0.70710677, %v4468_v54  ;;  %v1503_v15 = vadd.f32 0.05243302, %v1502_v7  ;;  %v1148_v17 = vmul.f32 %v1147_v0, %v4397_v21  ;;  %v1171_v31 = vor.u32 1.1754944e-38, %v1170_v3 }
  0xda   :  { %v1160_v1 = vmul.f32 %v4157_v19, %v4450_v23  ;;  %4158 = vrcp.f32 %v4471_v58  ;;  %vm1165_vm1 = vweird.f32 %v4157_v19  ;;  %v4493_v13 = vadd.f32 1.0, %v1477_v6  ;;  %v973_v27 = vpop.f32.mrf.mxu2 }
  0xdb   :  { %v1216_v11 = vmul.f32 %v4476_v63, %v4476_v63  ;;  %vm4500_vm2 = vmor %vm1164_vm0, %vm1165_vm1  ;;  %v4505_v22 = vmul.f32 0.5, %v4429_v56  ;;  %v217_v51 = vperm.slane %v4390_v14, 3  ;;  %vm1169_vm3 = vcmp.eq.f32.partialorder %v1168_v43, 8.507059e+37 }
  0xdc   :  { %v1161_v5 = vsub.f32 1.0, %v1160_v1  ;;  %4160 = vrcp.f32 %v4493_v13  ;;  %v1210_v29 = vand.u32 2147483648, %v4471_v58  ;;  %v1466_v30 = vmul.f32 %v1465_v10, %v4425_v52  ;;  %v987_v45 = vpop.f32.mrf.mxu3  ;;  %v947_v50 = vpop.f32.mrf.mxu0 }
  0xdd   :  { %v4511_v21 = vmin.f32 %v1216_v11, 16.0  ;;  %v1504_v56 = vmul.f32 %v1503_v15, %v4447_v18  ;;  %v4521_v34 = vmul.f32 %v1187_v9, %v4410_v33  ;;  %v1514_v35 = vadd.f32 0.112945676, %v1513_v16 }
  0xde   :  { %v1162_v12 = vmul.f32 %v4157_v19, %v1161_v5  ;;  %vm1204_vm4 = vweird.f32 %v4471_v58  ;;  %v974_v40 = vadd.f32 %v973_v27, %v217_v51  ;;  %v1208_v47 = vand.u32 2147483647, %v4471_v58  ;;  %v961_v8 = vpop.f32.mrf.mxu1 }
  0xdf   :  { %v1218_v36 = vmul.f32 2.1237322e-06, %v4511_v21  ;;  %v1505_v41 = vadd.f32 0.18741608, %v1504_v56  ;;  %v1515_v52 = vmul.f32 %v1514_v35, %v4447_v18  ;;  %v1229_v44 = vmul.f32 3.8918573e-05, %v4511_v21 }
  0xe0   :  { %v4508_v55 = vpop.eup %4158  ;;  %v1163_v24 = vadd.f32 %v4157_v19, %v1162_v12  ;;  %v1211_v48 = vor.u32 1.1754944e-38, %v1210_v29  ;;  %v1467_v49 = vadd.f32 1.1283791, %v1466_v30  ;;  %v988_v25 = vadd.f32 %v987_v45, %v974_v40  ;;  %v4048_v29 = vld [vmem:[#allocation8 + $0xf4] sm:$0xf0] }
  0xe1   :  { %v1200_v23 = vmul.f32 %v4508_v55, %v4471_v58  ;;  %v1219_v42 = vadd.f32 0.00028619796, %v1218_v36  ;;  %v1516_v59 = vadd.f32 0.4994258, %v1515_v52  ;;  %vm1205_vm5 = vweird.f32 %v4508_v55  ;;  %v3417_v52 = vld [vmem:[#allocation8 + $0x50] sm:$0xf] }
  0xe2   :  { %v1167_v32 = vsel %vm4500_vm2, %v4157_v19, %v1163_v24  ;;  %v4161_v53 = vpop.eup %4160  ;;  %v1230_v19 = vadd.f32 0.001143296, %v1229_v44  ;;  %v1506_v0 = vmul.f32 %v1505_v41, %v4447_v18  ;;  %v948_v3 = vadd.f32 %v947_v50, %v216_v26  ;;  %vm4544_vm7 = vmor %vm1204_vm4, %vm1205_vm5  ;;  %v4022_v30 = vld [vmem:[#allocation8 + $0x24] sm:$0xf0] }
  0xe3   :  { %v1172_v37 = vsel %vm1169_vm3, %v1171_v31, %v1167_v32  ;;  %v1201_v39 = vsub.f32 1.0, %v1200_v23  ;;  %v1220_v60 = vmul.f32 %v1219_v42, %v4511_v21  ;;  %v1480_v62 = vmul.f32 %v4161_v53, %v4493_v13  ;;  %v3497_v23 = vld [vmem:[#allocation8 + $0xf0] sm:$0xf] }
  0xe4   :  { %v1173_v57 = vmul.f32 %v1172_v37, %v1148_v17  ;;  %v1517_v1 = vmul.f32 %v1516_v59, %v4447_v18  ;;  %v1231_v43 = vmul.f32 %v1230_v19, %v4511_v21  ;;  %vm1484_vm6 = vweird.f32 %v4493_v13 }
  0xe5   :  { %v1202_v33 = vmul.f32 %v4508_v55, %v1201_v39  ;;  %v1481_v5 = vsub.f32 1.0, %v1480_v62  ;;  %v1488_v6 = vand.u32 2147483647, %v4493_v13  ;;  %v1221_v7 = vadd.f32 0.0036580483, %v1220_v60  ;;  %v975_v60 = vpop.f32.mrf.mxu2 }
  0xe6   :  { %v3359_v9 = vclamps-f32 %v1173_v57, 1.0  ;;  %vm1485_vm8 = vweird.f32 %v4161_v53  ;;  %v1490_v18 = vand.u32 2147483648, %v4493_v13  ;;  %v4549_v11 = vadd.f32 1.0, %v1517_v1 }
  0xe7   :  { %v1203_v61 = vadd.f32 %v4508_v55, %v1202_v33  ;;  %v1482_v12 = vmul.f32 %v4161_v53, %v1481_v5  ;;  %v1232_v15 = vadd.f32 0.014752088, %v1231_v43  ;;  %v4554_v16 = vmul.f32 0.70710677, %v988_v25  ;;  %vm4565_vm10 = vmor %vm1484_vm6, %vm1485_vm8 }
  0xe8   :  { %vm1209_vm9 = vcmp.eq.f32.partialorder %v1208_v47, 8.507059e+37  ;;  %v1507_v17 = vadd.f32 1.1283791, %v1506_v0  ;;  %4162 = vrcp.f32 %v4549_v11  ;;  %v4557_v58 = vadd.f32 %v961_v8, %v948_v3  ;;  %v4028_v47 = vld [vmem:[#allocation8 + $0x54] sm:$0xf0] }
  0xe9   :  { %v1207_v26 = vsel %vm4544_vm7, %v4508_v55, %v1203_v61  ;;  %v1468_v20 = vmul.f32 %v1467_v49, %v4415_v38  ;;  %v1483_v31 = vadd.f32 %v4161_v53, %v1482_v12  ;;  %v1222_v24 = vmul.f32 %v1221_v7, %v4511_v21 }
  0xea   :  { %v1233_v27 = vmul.f32 %v1232_v15, %v4511_v21  ;;  %v1212_v55 = vsel %vm1209_vm9, %v1211_v48, %v1207_v26  ;;  %vm4569_vm11 = vcmp.eq.f32.partialorder %v1488_v6, 8.507059e+37  ;;  %v4574_v38 = vmul.f32 0.5, %v4468_v54  ;;  %v989_v26 = vpop.f32.mrf.mxu3 }
  0xeb   :  { %v1256_v32 = vmul.f32 %v4554_v16, %v4554_v16  ;;  %v4578_v35 = vadd.f32 1.0, %v3359_v9  ;;  %v1487_v36 = vsel %vm4565_vm10, %v4161_v53, %v1483_v31  ;;  %v1491_v13 = vor.u32 1.1754944e-38, %v1490_v18 }
  0xec   :  { %v1234_v37 = vadd.f32 0.112945676, %v1233_v27  ;;  %v4583_v39 = vmul.f32 %v1507_v17, %v4437_v4  ;;  %v4588_v41 = vmul.f32 0.70710677, %v4557_v58  ;;  %v3498_v54 = vor.u32 %v4048_v29, %v3497_v23  ;;  %v3489_v23 = vld [vmem:[#allocation8 + $0xe0] sm:$0xf] }
  0xed   :  { %v4585_v40 = vmin.f32 %v1256_v32, 16.0  ;;  %v1213_v42 = vmul.f32 %v1212_v55, %v4521_v34  ;;  %v1223_v44 = vadd.f32 0.05243302, %v1222_v24  ;;  %v4592_v33 = vmul.f32 0.5, %v988_v25  ;;  %v4046_v29 = vld [vmem:[#allocation8 + $0xe4] sm:$0xf0] }
  0xee   :  { %v1235_v45 = vmul.f32 %v1234_v37, %v4511_v21  ;;  %v4163_v48 = vpop.eup %4162  ;;  %v1492_v4 = vsel %vm4569_vm11, %v1491_v13, %v1487_v36  ;;  %v1536_v53 = vmul.f32 %v4588_v41, %v4588_v41  ;;  %2604 = vmatpush.bf16.msra.mxu1 %v3498_v54  ;;  %vm1524_vm12 = vweird.f32 %v4549_v11  ;;  %v3409_v36 = vld [vmem:[#allocation8 + $0x40] sm:$0xf]  ;;  %v4026_v13 = vld [vmem:[#allocation8 + $0x44] sm:$0xf0] }
  0xef   :  { %v1258_v49 = vmul.f32 2.1237322e-06, %v4585_v40  ;;  %v1269_v50 = vmul.f32 3.8918573e-05, %v4585_v40  ;;  %v1520_v34 = vmul.f32 %v4163_v48, %v4549_v11  ;;  %v1528_v57 = vand.u32 2147483647, %v4549_v11 }
  0xf0   :  { %v1530_v59 = vand.u32 2147483648, %v4549_v11  ;;  %v1236_v19 = vadd.f32 0.4994258, %v1235_v45  ;;  %v3418_v25 = vor.u32 %v4028_v47, %v3417_v52  ;;  %v1493_v0 = vmul.f32 %v1492_v4, %v1468_v20  ;;  %v3401_v45 = vld [vmem:[#allocation8 + $0x30] sm:$0xf] }
  0xf1   :  { %v1259_v61 = vadd.f32 0.00028619796, %v1258_v49  ;;  %v1270_v62 = vadd.f32 0.001143296, %v1269_v50  ;;  %v1521_v1 = vsub.f32 1.0, %v1520_v34  ;;  %v1224_v43 = vmul.f32 %v1223_v44, %v4511_v21 }
  0xf2   :  { %v4605_v3 = vmin.f32 %v1536_v53, 16.0  ;;  %v1237_v5 = vmul.f32 %v1236_v19, %v4511_v21  ;;  %v976_v8 = vadd.f32 %v975_v60, %v217_v51  ;;  %2592 = vmatpush.bf16.msra.mxu0 %v3418_v25  ;;  %v3360_v9 = vclamps-f32 %v1213_v42, 1.0  ;;  %v3481_v42 = vld [vmem:[#allocation8 + $0xd0] sm:$0xf]  ;;  %v4044_v44 = vld [vmem:[#allocation8 + $0xd4] sm:$0xf0] }
  0xf3   :  { %v1260_v6 = vmul.f32 %v1259_v61, %v4585_v40  ;;  %v1271_v7 = vmul.f32 %v1270_v62, %v4585_v40  ;;  %v1522_v10 = vmul.f32 %v4163_v48, %v1521_v1  ;;  %vm1525_vm13 = vweird.f32 %v4163_v48  ;;  %v4024_v53 = vld [vmem:[#allocation8 + $0x34] sm:$0xf0] }
  0xf4   :  { %v1538_v18 = vmul.f32 2.1237322e-06, %v4605_v3  ;;  %vm4613_vm14 = vcmp.eq.f32.partialorder %v1528_v57, 8.507059e+37  ;;  %v4617_v15 = vadd.f32 1.0, %v1237_v5  ;;  %v1225_v24 = vadd.f32 0.18741608, %v1224_v43  ;;  %vm4622_vm15 = vmor %vm1524_vm12, %vm1525_vm13 }
  0xf5   :  { %v1261_v17 = vadd.f32 0.0036580483, %v1260_v6  ;;  %v1272_v20 = vadd.f32 0.014752088, %v1271_v7  ;;  %v1523_v31 = vadd.f32 %v4163_v48, %v1522_v10  ;;  %v1549_v51 = vmul.f32 3.8918573e-05, %v4605_v3 }
  0xf6   :  { %v1539_v27 = vadd.f32 0.00028619796, %v1538_v18  ;;  %v3367_v55 = vclamps-f32 %v1493_v0, 1.0  ;;  %v1531_v56 = vor.u32 1.1754944e-38, %v1530_v59  ;;  %4164 = vrcp.f32 %v4617_v15  ;;  %v3473_v7 = vld [vmem:[#allocation8 + $0xc0] sm:$0xf] }
  0xf7   :  { %v4627_v32 = vadd.f32 %v989_v26, %v976_v8  ;;  %v1527_v37 = vsel %vm4622_vm15, %v4163_v48, %v1523_v31  ;;  %v1262_v54 = vmul.f32 %v1261_v17, %v4585_v40  ;;  %v1273_v52 = vmul.f32 %v1272_v20, %v4585_v40  ;;  %v4042_v18 = vld [vmem:[#allocation8 + $0xc4] sm:$0xf0] }
  0xf8   :  { %v1540_v11 = vmul.f32 %v1539_v27, %v4605_v3  ;;  %v4636_v47 = vmul.f32 %v4578_v35, %v4462_v46  ;;  %v1777_v4 = vadd.f32 1.0, %v3360_v9  ;;  %v1532_v49 = vsel %vm4613_vm14, %v1531_v56, %v1527_v37 }
  0xf9   :  { %v1550_v50 = vadd.f32 0.001143296, %v1549_v51  ;;  %v1226_v48 = vmul.f32 %v1225_v24, %v4511_v21  ;;  %v1263_v34 = vadd.f32 0.05243302, %v1262_v54  ;;  %v1274_v57 = vadd.f32 0.112945676, %v1273_v52 }
  0xfa   :  { %v1541_v59 = vadd.f32 0.0036580483, %v1540_v11  ;;  %v4643_v19 = vmul.f32 0.70710677, %v4627_v32  ;;  %v3490_v61 = vor.u32 %v4046_v29, %v3489_v23  ;;  %v3410_v62 = vor.u32 %v4026_v13, %v3409_v36  ;;  %v3393_v23 = vld [vmem:[#allocation8 + $0x20] sm:$0xf] }
  0xfb   :  { %v1551_v60 = vmul.f32 %v1550_v50, %v4605_v3  ;;  %v1784_v46 = vadd.f32 1.0, %v3367_v55  ;;  %v1533_v35 = vmul.f32 %v1532_v49, %v4583_v39  ;;  %v1264_v25 = vmul.f32 %v1263_v34, %v4585_v40  ;;  %v3465_v50 = vld [vmem:[#allocation8 + $0xb0] sm:$0xf] }
  0xfc   :  { %v1275_v0 = vmul.f32 %v1274_v57, %v4585_v40  ;;  %v4648_v1 = vpop.eup %4164  ;;  %v1576_v43 = vmul.f32 %v4643_v19, %v4643_v19  ;;  %2605 = vmatpush.bf16.msra.mxu1 %v3490_v61  ;;  %2593 = vmatpush.bf16.msra.mxu0 %v3410_v62  ;;  %v3482_v5 = vor.u32 %v4044_v44, %v3481_v42  ;;  %v1227_v8 = vadd.f32 1.1283791, %v1226_v48  ;;  %v1001_v57 = vpop.f32.mrf.mxu0 }
  0xfd   :  { %v1552_v21 = vadd.f32 0.014752088, %v1551_v60  ;;  %v3402_v6 = vor.u32 %v4024_v53, %v3401_v45  ;;  %v1240_v9 = vmul.f32 %v4648_v1, %v4617_v15  ;;  %v4655_v39 = vmul.f32 0.5, %v4557_v58  ;;  %v4040_v53 = vld [vmem:[#allocation8 + $0xb4] sm:$0xf0] }
  0xfe   :  { %v1542_v10 = vmul.f32 %v1541_v59, %v4605_v3  ;;  %v4659_v26 = vmul.f32 %v1777_v4, %v4480_v2  ;;  %v1276_v12 = vadd.f32 0.4994258, %v1275_v0  ;;  %v4662_v20 = vmin.f32 %v1576_v43, 16.0  ;;  %v3385_v59 = vld [vmem:[#allocation8 + $0x10] sm:$0xf] }
  0xff   :  { %v1553_v17 = vmul.f32 %v1552_v21, %v4605_v3  ;;  %v1800_v31 = vmul.f32 %v1784_v46, %v4489_v28  ;;  %v3368_v24 = vclamps-f32 %v1533_v35, 1.0  ;;  %v1241_v27 = vsub.f32 1.0, %v1240_v9  ;;  %v4020_v60 = vld [vmem:[#allocation8 + $0x14] sm:$0xf0]  ;;  %v3457_v35 = vld [vmem:[#allocation8 + $0xa0] sm:$0xf] }
 0x100   :  { %v1265_v51 = vadd.f32 0.18741608, %v1264_v25  ;;  %v1277_v58 = vmul.f32 %v1276_v12, %v4585_v40  ;;  %v1578_v55 = vmul.f32 2.1237322e-06, %v4662_v20  ;;  %2606 = vmatpush.bf16.msra.mxu1 %v3482_v5  ;;  %2594 = vmatpush.bf16.msra.mxu0 %v3402_v6  ;;  %v3474_v2 = vor.u32 %v4042_v18, %v3473_v7  ;;  %v4038_v5 = vld [vmem:[#allocation8 + $0xa4] sm:$0xf0] }
 0x101   :  { %v1554_v29 = vadd.f32 0.112945676, %v1553_v17  ;;  %v4668_v56 = vmul.f32 %v1227_v8, %v4476_v63  ;;  %v1248_v36 = vand.u32 2147483647, %v4617_v15  ;;  %v1543_v13 = vadd.f32 0.05243302, %v1542_v10 }
 0x102   :  { %v1589_v28 = vmul.f32 3.8918573e-05, %v4662_v20  ;;  %v1250_v37 = vand.u32 2147483648, %v4617_v15  ;;  %v4673_v54 = vadd.f32 1.0, %v1277_v58  ;;  %v1579_v11 = vadd.f32 0.00028619796, %v1578_v55 }
 0x103   :  { %v1555_v52 = vmul.f32 %v1554_v29, %v4605_v3  ;;  %v1242_v42 = vmul.f32 %v4648_v1, %v1241_v27  ;;  %v1266_v44 = vmul.f32 %v1265_v51, %v4585_v40  ;;  %v3394_v4 = vor.u32 %v4022_v30, %v3393_v23  ;;  %v1015_v51 = vpop.f32.mrf.mxu1  ;;  %v3377_v58 = vld [vmem:[#allocation8] sm:$0xf]  ;;  %v3561_v30 = vld [vmem:[#allocation8 + $0x170] sm:$0xf] }
 0x104   :  { %v1590_v45 = vadd.f32 0.001143296, %v1589_v28  ;;  %v1785_v63 = vadd.f32 1.0, %v3368_v24  ;;  %vm1244_vm0 = vweird.f32 %v4617_v15  ;;  %4166 = vrcp.f32 %v4673_v54  ;;  %2607 = vmatpush.bf16.msra.mxu1 %v3474_v2  ;;  %v4018_v2 = vld [vmem:[#allocation8 + $0x4] sm:$0xf0] }
 0x105   :  { %v4681_v49 = vmul.f32 0.5, %v4627_v32  ;;  %vm1245_vm1 = vweird.f32 %v4648_v1  ;;  %v1544_v48 = vmul.f32 %v1543_v13, %v4605_v3  ;;  %v1556_v34 = vadd.f32 0.4994258, %v1555_v52  ;;  %2595 = vmatpush.bf16.msra.mxu0 %v3394_v4  ;;  %v3449_v52 = vld [vmem:[#allocation8 + $0x90] sm:$0xf] }
 0x106   :  { %v1580_v40 = vmul.f32 %v1579_v11, %v4662_v20  ;;  %v4687_v61 = vpack.c.bf16 %v1800_v31, %v4636_v47  ;;  %vm4689_vm2 = vcmp.eq.f32.partialorder %v1248_v36, 8.507059e+37  ;;  %v1251_v62 = vor.u32 1.1754944e-38, %v1250_v37  ;;  %vm4700_vm3 = vmor %vm1244_vm0, %vm1245_vm1  ;;  %v4064_v36 = vld [vmem:[#allocation8 + $0x174] sm:$0xf0] }
 0x107   :  { %v1591_v46 = vmul.f32 %v1590_v45, %v4662_v20  ;;  %v1243_v25 = vadd.f32 %v4648_v1, %v1242_v42  ;;  %v1267_v0 = vadd.f32 1.1283791, %v1266_v44  ;;  %v1557_v21 = vmul.f32 %v1556_v34, %v4605_v3  ;;  %v1029_v44 = vpop.f32.mrf.mxu2  ;;  %v4036_v45 = vld [vmem:[#allocation8 + $0x94] sm:$0xf0] }
 0x108   :  { %v1581_v43 = vadd.f32 0.0036580483, %v1580_v40  ;;  %v3466_v7 = vor.u32 %v4040_v53, %v3465_v50  ;;  %v218_v8 = vperm.slane %v4390_v14, 4  ;;  %v3386_v9 = vor.u32 %v4020_v60, %v3385_v59  ;;  %v1003_v40 = vpop.f32.mrf.mxu0 }
 0x109   :  { %v1592_v6 = vadd.f32 0.014752088, %v1591_v46  ;;  %v4706_v10 = vmul.f32 %v1785_v63, %v4505_v22  ;;  %v1545_v18 = vadd.f32 0.18741608, %v1544_v48  ;;  %v4708_v12 = vadd.f32 1.0, %v1557_v21 }
 0x10a   :  { %v1582_v17 = vmul.f32 %v1581_v43, %v4662_v20  ;;  %v4711_v31 = vpop.eup %4166  ;;  %v1288_v15 = vand.u32 2147483647, %v4673_v54  ;;  %2608 = vmatpush.bf16.msra.mxu1 %v3466_v7  ;;  %v1002_v27 = vadd.f32 %v1001_v57, %v218_v8  ;;  %2596 = vmatpush.bf16.msra.mxu0 %v3386_v9  ;;  %v3458_v23 = vor.u32 %v4038_v5, %v3457_v35  ;;  %v1043_v57 = vpop.f32.mrf.mxu3  ;;  %v3689_v46 = vld [vmem:[#allocation8 + $0x270] sm:$0xf]  ;;  %v4096_v35 = vld [vmem:[#allocation8 + $0x274] sm:$0xf0] }
 0x10b   :  { %v1593_v24 = vmul.f32 %v1592_v6, %v4662_v20  ;;  %v1247_v22 = vsel %vm4700_vm3, %v4648_v1, %v1243_v25  ;;  %v4719_v29 = vmul.f32 %v1267_v0, %v4554_v16  ;;  %v1280_v55 = vmul.f32 %v4711_v31, %v4673_v54 }
 0x10c   :  { %4168 = vrcp.f32 %v4708_v12  ;;  %vm1284_vm4 = vweird.f32 %v4673_v54  ;;  %v1290_v13 = vand.u32 2147483648, %v4673_v54  ;;  %v1583_v28 = vadd.f32 0.05243302, %v1582_v17 }
 0x10d   :  { %v219_v37 = vperm.slane %v4390_v14, 5  ;;  %v1281_v1 = vsub.f32 1.0, %v1280_v55  ;;  %v1546_v16 = vmul.f32 %v1545_v18, %v4605_v3  ;;  %v1594_v11 = vadd.f32 0.112945676, %v1593_v24  ;;  %v3537_v14 = vld [vmem:[#allocation8 + $0x140] sm:$0xf] }
 0x10e   :  { %v4728_v42 = vadd.f32 %v1015_v51, %v1002_v27  ;;  %v1252_v4 = vsel %vm4689_vm2, %v1251_v62, %v1247_v22  ;;  %vm4732_vm5 = vcmp.eq.f32.partialorder %v1288_v15, 8.507059e+37  ;;  %v1584_v50 = vmul.f32 %v1583_v28, %v4662_v20  ;;  %2609 = vmatpush.bf16.msra.mxu1 %v3458_v23  ;;  %v1017_v23 = vpop.f32.mrf.mxu1 }
 0x10f   :  { %v3378_v53 = vor.u32 %v4018_v2, %v3377_v58  ;;  %v1282_v48 = vmul.f32 %v4711_v31, %v1281_v1  ;;  %vm1285_vm6 = vweird.f32 %v4711_v31  ;;  %v1595_v3 = vmul.f32 %v1594_v11, %v4662_v20 }
 0x110   :  { %v4741_v34 = vmul.f32 0.70710677, %v4728_v42  ;;  %v1291_v59 = vor.u32 1.1754944e-38, %v1290_v13  ;;  %v1030_v60 = vadd.f32 %v1029_v44, %v219_v37  ;;  %v3562_v32 = vor.u32 %v4064_v36, %v3561_v30  ;;  %vm1286_vm7 = vmor %vm1284_vm4, %vm1285_vm6 }
 0x111   :  { %2597 = vmatpush.bf16.msra.mxu0 %v3378_v53  ;;  %v3450_v62 = vor.u32 %v4036_v45, %v3449_v52  ;;  %v4746_v0 = vmul.f32 %v1252_v4, %v4668_v56  ;;  %v1283_v21 = vadd.f32 %v4711_v31, %v1282_v48  ;;  %v1596_v43 = vadd.f32 0.4994258, %v1595_v3  ;;  %v3553_v45 = vld [vmem:[#allocation8 + $0x160] sm:$0xf] }
 0x112   :  { %v4169_v25 = vpop.eup %4168  ;;  %v1296_v5 = vmul.f32 %v4741_v34, %v4741_v34  ;;  %v1585_v6 = vadd.f32 0.18741608, %v1584_v50  ;;  %2618 = vmatpush.bf16.msra.mxu2 %v3562_v32  ;;  %v1004_v7 = vadd.f32 %v1003_v40, %v218_v8  ;;  %v4756_v9 = vadd.f32 %v1043_v57, %v1030_v60  ;;  %v3441_v50 = vld [vmem:[#allocation8 + $0x80] sm:$0xf] }
 0x113   :  { %v1560_v47 = vmul.f32 %v4169_v25, %v4708_v12  ;;  %2610 = vmatpush.bf16.msra.mxu1 %v3450_v62  ;;  %v1287_v56 = vsel %vm1286_vm7, %v4711_v31, %v1283_v21  ;;  %v1597_v18 = vmul.f32 %v1596_v43, %v4662_v20  ;;  %v3690_v15 = vor.u32 %v4096_v35, %v3689_v46  ;;  %v3625_v62 = vld [vmem:[#allocation8 + $0x1f0] sm:$0xf] }
 0x114   :  { %v4760_v17 = vmin.f32 %v1296_v5, 16.0  ;;  %2598 = vmatmul.bf16.vlgmr.msra.gmra.mxu0 %v4687_v61  ;;  %v1292_v54 = vsel %vm4732_vm5, %v1291_v59, %v1287_v56  ;;  %v1547_v24 = vadd.f32 1.1283791, %v1546_v16  ;;  %v1568_v51 = vand.u32 2147483647, %v4708_v12 }
 0x115   :  { %v1561_v27 = vsub.f32 1.0, %v1560_v47  ;;  %vm1564_vm8 = vweird.f32 %v4708_v12  ;;  %v4767_v8 = vadd.f32 1.0, %v1597_v18  ;;  %2646 = vmatpush.bf16.msrb.mxu0 %v3690_v15  ;;  %vm1565_vm9 = vweird.f32 %v4169_v25  ;;  %v4080_v5 = vld [vmem:[#allocation8 + $0x1f4] sm:$0xf0] }
 0x116   :  { %v1298_v31 = vmul.f32 2.1237322e-06, %v4760_v17  ;;  %v1309_v58 = vmul.f32 3.8918573e-05, %v4760_v17  ;;  %v1570_v55 = vand.u32 2147483648, %v4708_v12  ;;  %v4776_v30 = vmul.f32 %v1292_v54, %v4719_v29  ;;  %vm4790_vm10 = vmor %vm1564_vm8, %vm1565_vm9 }
 0x117   :  { %v1562_v22 = vmul.f32 %v4169_v25, %v1561_v27  ;;  %v4773_v2 = vmul.f32 0.70710677, %v4756_v9  ;;  %v1586_v36 = vmul.f32 %v1585_v6, %v4662_v20  ;;  %4170 = vrcp.f32 %v4767_v8  ;;  %v4034_v12 = vld [vmem:[#allocation8 + $0x84] sm:$0xf0] }
 0x118   :  { %v4780_v13 = vadd.f32 %v1017_v23, %v1004_v7  ;;  %v4784_v28 = vpack.c.bf16 %v4706_v10, %v4659_v26  ;;  %v1299_v1 = vadd.f32 0.00028619796, %v1298_v31  ;;  %v1310_v16 = vadd.f32 0.001143296, %v1309_v58  ;;  %v4062_v26 = vld [vmem:[#allocation8 + $0x164] sm:$0xf0] }
 0x119   :  { %v1563_v52 = vadd.f32 %v4169_v25, %v1562_v22  ;;  %v3361_v11 = vclamps-f32 %v4746_v0, 1.0  ;;  %v1548_v44 = vmul.f32 %v1547_v24, %v4588_v41  ;;  %vm1569_vm11 = vcmp.eq.f32.partialorder %v1568_v51, 8.507059e+37  ;;  %v4094_v29 = vld [vmem:[#allocation8 + $0x264] sm:$0xf0] }
 0x11a   :  { %v1336_v20 = vmul.f32 %v4773_v2, %v4773_v2  ;;  %v1571_v4 = vor.u32 1.1754944e-38, %v1570_v55  ;;  %v1300_v63 = vmul.f32 %v1299_v1, %v4760_v17  ;;  %v1311_v41 = vmul.f32 %v1310_v16, %v4760_v17  ;;  %v3681_v16 = vld [vmem:[#allocation8 + $0x260] sm:$0xf] }
 0x11b   :  { %v1567_v10 = vsel %vm4790_vm10, %v4169_v25, %v1563_v52  ;;  %v3362_v53 = vclamps-f32 %v4776_v30, 1.0  ;;  %v4801_v48 = vadd.f32 1.1283791, %v1586_v36  ;;  %v4806_v40 = vmul.f32 0.70710677, %v4780_v13 }
 0x11c   :  { %v4803_v3 = vmin.f32 %v1336_v20, 16.0  ;;  %v1572_v57 = vsel %vm1569_vm11, %v1571_v4, %v1567_v10  ;;  %v1301_v59 = vadd.f32 0.0036580483, %v1300_v63  ;;  %v1312_v60 = vadd.f32 0.014752088, %v1311_v41 }
 0x11d   :  { %v3554_v32 = vor.u32 %v4062_v26, %v3553_v45  ;;  %v4171_v46 = vpop.eup %4170  ;;  %v1616_v21 = vmul.f32 %v4806_v40, %v4806_v40  ;;  %v3442_v43 = vor.u32 %v4034_v12, %v3441_v50  ;;  %vm1604_vm12 = vweird.f32 %v4767_v8 }
 0x11e   :  { %v1338_v35 = vmul.f32 2.1237322e-06, %v4803_v3  ;;  %v1349_v25 = vmul.f32 3.8918573e-05, %v4803_v3  ;;  %v1600_v47 = vmul.f32 %v4171_v46, %v4767_v8  ;;  %v1610_v6 = vand.u32 2147483648, %v4767_v8 }
 0x11f   :  { %v1302_v7 = vmul.f32 %v1301_v59, %v4760_v17  ;;  %2619 = vmatpush.bf16.msra.mxu2 %v3554_v32  ;;  %v1313_v56 = vmul.f32 %v1312_v60, %v4760_v17  ;;  %v4817_v54 = vmin.f32 %v1616_v21, 16.0  ;;  %2611 = vmatpush.bf16.msra.mxu1 %v3442_v43  ;;  %v1573_v24 = vmul.f32 %v1572_v57, %v1548_v44 }
 0x120   :  { %v1339_v18 = vadd.f32 0.00028619796, %v1338_v35  ;;  %v1350_v15 = vadd.f32 0.001143296, %v1349_v25  ;;  %v1601_v27 = vsub.f32 1.0, %v1600_v47  ;;  %v3626_v23 = vor.u32 %v4080_v5, %v3625_v62 }
 0x121   :  { %v1303_v51 = vadd.f32 0.05243302, %v1302_v7  ;;  %v1314_v31 = vadd.f32 0.112945676, %v1313_v56  ;;  %v1618_v55 = vmul.f32 2.1237322e-06, %v4817_v54  ;;  %vm1605_vm13 = vweird.f32 %v4171_v46 }
 0x122   :  { %v1340_v58 = vmul.f32 %v1339_v18, %v4803_v3  ;;  %v1351_v22 = vmul.f32 %v1350_v15, %v4803_v3  ;;  %v1602_v36 = vmul.f32 %v4171_v46, %v1601_v27  ;;  %v1629_v1 = vmul.f32 3.8918573e-05, %v4817_v54  ;;  %2632 = vmatpush.bf16.msra.mxu3 %v3626_v23  ;;  %2612 = vmatmul.bf16.vlgmr.msra.gmra.mxu1 %v4784_v28  ;;  %vm4830_vm14 = vmor %vm1604_vm12, %vm1605_vm13  ;;  %v3545_v27 = vld [vmem:[#allocation8 + $0x150] sm:$0xf] }
 0x123   :  { %v1304_v52 = vmul.f32 %v1303_v51, %v4760_v17  ;;  %v1315_v44 = vmul.f32 %v1314_v31, %v4760_v17  ;;  %v1619_v26 = vadd.f32 0.00028619796, %v1618_v55  ;;  %v1608_v4 = vand.u32 2147483647, %v4767_v8  ;;  %v4060_v51 = vld [vmem:[#allocation8 + $0x154] sm:$0xf0] }
 0x124   :  { %v1341_v20 = vadd.f32 0.0036580483, %v1340_v58  ;;  %v1352_v45 = vadd.f32 0.014752088, %v1351_v22  ;;  %v1603_v10 = vadd.f32 %v4171_v46, %v1602_v36  ;;  %v1611_v63 = vor.u32 1.1754944e-38, %v1610_v6 }
 0x125   :  { %v1630_v41 = vadd.f32 0.001143296, %v1629_v1  ;;  %v1316_v12 = vadd.f32 0.4994258, %v1315_v44  ;;  %v1620_v60 = vmul.f32 %v1619_v26, %v4817_v54  ;;  %v3369_v32 = vclamps-f32 %v1573_v24, 1.0  ;;  %v1031_v24 = vpop.f32.mrf.mxu2 }
 0x126   :  { %v1342_v57 = vmul.f32 %v1341_v20, %v4803_v3  ;;  %v1353_v59 = vmul.f32 %v1352_v45, %v4803_v3  ;;  %v1607_v62 = vsel %vm4830_vm14, %v4171_v46, %v1603_v10  ;;  %v3682_v25 = vor.u32 %v4094_v29, %v3681_v16  ;;  %v3753_v58 = vld [vmem:[#allocation8 + $0x2f0] sm:$0xf]  ;;  %v4112_v22 = vld [vmem:[#allocation8 + $0x2f4] sm:$0xf0]  ;;  %v3617_v1 = vld [vmem:[#allocation8 + $0x1e0] sm:$0xf]  ;;  %v1045_v10 = vpop.f32.mrf.mxu3 }
 0x127   :  { %v1631_v35 = vmul.f32 %v1630_v41, %v4817_v54  ;;  %v1305_v21 = vadd.f32 0.18741608, %v1304_v52  ;;  %v1317_v8 = vmul.f32 %v1316_v12, %v4760_v17  ;;  %v1778_v47 = vadd.f32 1.0, %v3361_v11  ;;  %v4078_v16 = vld [vmem:[#allocation8 + $0x1e4] sm:$0xf0] }
 0x128   :  { %v1343_v43 = vadd.f32 0.05243302, %v1342_v57  ;;  %v1354_v5 = vadd.f32 0.112945676, %v1353_v59  ;;  %vm1609_vm15 = vcmp.eq.f32.partialorder %v1608_v4, 8.507059e+37  ;;  %2647 = vmatpush.bf16.msrb.mxu0 %v3682_v25  ;;  %v1786_v23 = vadd.f32 1.0, %v3369_v32 }
 0x129   :  { %v1621_v6 = vadd.f32 0.0036580483, %v1620_v60  ;;  %v1632_v7 = vadd.f32 0.014752088, %v1631_v35  ;;  %v1612_v56 = vsel %vm1609_vm15, %v1611_v63, %v1607_v62  ;;  %v4843_v18 = vadd.f32 1.0, %v1317_v8 }
 0x12a   :  { %v1344_v46 = vmul.f32 %v1343_v43, %v4803_v3  ;;  %v1355_v15 = vmul.f32 %v1354_v5, %v4803_v3  ;;  %v1588_v31 = vmul.f32 %v4801_v48, %v4643_v19  ;;  %v4853_v55 = vadd.f32 1.0, %v3362_v53  ;;  %v3673_v20 = vld [vmem:[#allocation8 + $0x250] sm:$0xf]  ;;  %v4092_v45 = vld [vmem:[#allocation8 + $0x254] sm:$0xf0] }
 0x12b   :  { %v1622_v0 = vmul.f32 %v1621_v6, %v4817_v54  ;;  %v1633_v11 = vmul.f32 %v1632_v7, %v4817_v54  ;;  %v4856_v36 = vmul.f32 0.5, %v4728_v42  ;;  %v1306_v52 = vmul.f32 %v1305_v21, %v4760_v17  ;;  %v3745_v59 = vld [vmem:[#allocation8 + $0x2e0] sm:$0xf]  ;;  %v4110_v60 = vld [vmem:[#allocation8 + $0x2e4] sm:$0xf0] }
 0x12c   :  { %4172 = vrcp.f32 %v4843_v18  ;;  %v1613_v19 = vmul.f32 %v1612_v56, %v1588_v31  ;;  %v1356_v48 = vadd.f32 0.4994258, %v1355_v15  ;;  %v1032_v29 = vadd.f32 %v1031_v24, %v219_v37  ;;  %v4058_v37 = vld [vmem:[#allocation8 + $0x144] sm:$0xf0]  ;;  %v3609_v35 = vld [vmem:[#allocation8 + $0x1d0] sm:$0xf] }
 0x12d   :  { %v3546_v44 = vor.u32 %v4060_v51, %v3545_v27  ;;  %v1794_v30 = vmul.f32 %v1778_v47, %v4574_v38  ;;  %v1345_v53 = vadd.f32 0.18741608, %v1344_v46  ;;  %v1623_v26 = vadd.f32 0.05243302, %v1622_v0  ;;  %v4076_v25 = vld [vmem:[#allocation8 + $0x1d4] sm:$0xf0] }
 0x12e   :  { %v1634_v42 = vadd.f32 0.112945676, %v1633_v11  ;;  %v1802_v17 = vmul.f32 %v1786_v23, %v4655_v39  ;;  %v1357_v4 = vmul.f32 %v1356_v48, %v4803_v3  ;;  %v4866_v63 = vmul.f32 0.5, %v4780_v13  ;;  %v3665_v6 = vld [vmem:[#allocation8 + $0x240] sm:$0xf] }
 0x12f   :  { %2620 = vmatpush.bf16.msra.mxu2 %v3546_v44  ;;  %v3754_v41 = vor.u32 %v4112_v22, %v3753_v58  ;;  %v1307_v50 = vadd.f32 1.1283791, %v1306_v52  ;;  %v1624_v12 = vmul.f32 %v1623_v26, %v4817_v54  ;;  %v3618_v57 = vor.u32 %v4078_v16, %v3617_v1  ;;  %v4090_v7 = vld [vmem:[#allocation8 + $0x244] sm:$0xf0]  ;;  %v3529_v15 = vld [vmem:[#allocation8 + $0x130] sm:$0xf] }
 0x130   :  { %v1635_v38 = vmul.f32 %v1634_v42, %v4817_v54  ;;  %v3370_v32 = vclamps-f32 %v1613_v19, 1.0  ;;  %v4870_v62 = vadd.f32 1.0, %v1357_v4  ;;  %v4872_v39 = vadd.f32 %v1045_v10, %v1032_v29  ;;  %v4056_v24 = vld [vmem:[#allocation8 + $0x134] sm:$0xf0]  ;;  %v3737_v27 = vld [vmem:[#allocation8 + $0x2d0] sm:$0xf] }
 0x131   :  { %2660 = vmatpush.bf16.msrb.mxu1 %v3754_v41  ;;  %v3674_v13 = vor.u32 %v4092_v45, %v3673_v20  ;;  %v1346_v8 = vmul.f32 %v1345_v53, %v4803_v3  ;;  %v1625_v43 = vadd.f32 0.18741608, %v1624_v12  ;;  %2633 = vmatpush.bf16.msra.mxu3 %v3618_v57  ;;  %v3538_v47 = vor.u32 %v4058_v37, %v3537_v14  ;;  %v4108_v51 = vld [vmem:[#allocation8 + $0x2d4] sm:$0xf0]  ;;  %v3601_v11 = vld [vmem:[#allocation8 + $0x1c0] sm:$0xf] }
 0x132   :  { %v4874_v21 = vpop.eup %4172  ;;  %v1636_v5 = vadd.f32 0.4994258, %v1635_v38  ;;  %v4877_v56 = vpack.c.bf16 %v1802_v17, %v1794_v30  ;;  %4174 = vrcp.f32 %v4870_v62  ;;  %v4883_v3 = vmul.f32 %v1307_v50, %v4741_v34  ;;  %v4074_v16 = vld [vmem:[#allocation8 + $0x1c4] sm:$0xf0]  ;;  %v3657_v44 = vld [vmem:[#allocation8 + $0x230] sm:$0xf] }
 0x133   :  { %v1320_v46 = vmul.f32 %v4874_v21, %v4843_v18  ;;  %2648 = vmatpush.bf16.msrb.mxu0 %v3674_v13  ;;  %v1328_v23 = vand.u32 2147483647, %v4843_v18  ;;  %v1330_v31 = vand.u32 2147483648, %v4843_v18  ;;  %v1626_v0 = vmul.f32 %v1625_v43, %v4817_v54  ;;  %2621 = vmatpush.bf16.msra.mxu2 %v3538_v47  ;;  %v4088_v20 = vld [vmem:[#allocation8 + $0x234] sm:$0xf0] }
 0x134   :  { %v1637_v22 = vmul.f32 %v1636_v5, %v4817_v54  ;;  %v4890_v52 = vmul.f32 0.70710677, %v4872_v39  ;;  %v3746_v1 = vor.u32 %v4110_v60, %v3745_v59  ;;  %v1787_v19 = vadd.f32 1.0, %v3370_v32  ;;  %v3521_v26 = vld [vmem:[#allocation8 + $0x120] sm:$0xf] }
 0x135   :  { %v1321_v58 = vsub.f32 1.0, %v1320_v46  ;;  %v1347_v48 = vadd.f32 1.1283791, %v1346_v8  ;;  %v1370_v34 = vand.u32 2147483648, %v4870_v62  ;;  %v3610_v29 = vor.u32 %v4076_v25, %v3609_v35  ;;  %v4054_v42 = vld [vmem:[#allocation8 + $0x124] sm:$0xf0] }
 0x136   :  { %v4894_v30 = vadd.f32 1.0, %v1637_v22  ;;  %v1656_v53 = vmul.f32 %v4890_v52, %v4890_v52  ;;  %2661 = vmatpush.bf16.msrb.mxu1 %v3746_v1  ;;  %v3666_v54 = vor.u32 %v4090_v7, %v3665_v6  ;;  %v1627_v10 = vadd.f32 1.1283791, %v1626_v0  ;;  %v3729_v14 = vld [vmem:[#allocation8 + $0x2c0] sm:$0xf]  ;;  %v1057_v7 = vpop.f32.mrf.mxu0 }
 0x137   :  { %v1322_v45 = vmul.f32 %v4874_v21, %v1321_v58  ;;  %2634 = vmatpush.bf16.msra.mxu3 %v3610_v29  ;;  %v3530_v17 = vor.u32 %v4056_v24, %v3529_v15  ;;  %v3738_v4 = vor.u32 %v4108_v51, %v3737_v27  ;;  %v3602_v41 = vor.u32 %v4074_v16, %v3601_v11  ;;  %v4106_v37 = vld [vmem:[#allocation8 + $0x2c4] sm:$0xf0]  ;;  %v3593_v50 = vld [vmem:[#allocation8 + $0x1b0] sm:$0xf]  ;;  %v4072_v57 = vld [vmem:[#allocation8 + $0x1b4] sm:$0xf0]  ;;  %v1071_v29 = vpop.f32.mrf.mxu1 }
 0x138   :  { %v4898_v12 = vpop.eup %4174  ;;  %vm1324_vm0 = vweird.f32 %v4843_v18  ;;  %vm1325_vm1 = vweird.f32 %v4874_v21  ;;  %4176 = vrcp.f32 %v4894_v30  ;;  %2649 = vmatpush.bf16.msrb.mxu0 %v3666_v54  ;;  %v3649_v59 = vld [vmem:[#allocation8 + $0x220] sm:$0xf]  ;;  %v4086_v60 = vld [vmem:[#allocation8 + $0x224] sm:$0xf0]  ;;  %vm4904_vm2 = vcmp.eq.f32.partialorder %v1328_v23, 8.507059e+37  ;;  %v4937_v16 = vld [vmem:[#allocation7] sm:$0xff] }
 0x139   :  { %v1323_v38 = vadd.f32 %v4874_v21, %v1322_v45  ;;  %v1331_v13 = vor.u32 1.1754944e-38, %v1330_v31  ;;  %v1360_v35 = vmul.f32 %v4898_v12, %v4870_v62  ;;  %v4910_v25 = vmin.f32 %v1656_v53, 16.0  ;;  %2622 = vmatpush.bf16.msra.mxu2 %v3530_v17  ;;  %v3513_v8 = vld [vmem:[#allocation8 + $0x110] sm:$0xf]  ;;  %v4052_v46 = vld [vmem:[#allocation8 + $0x114] sm:$0xf0]  ;;  %vm4922_vm3 = vmor %vm1324_vm0, %vm1325_vm1 }
 0x13a   :  { %v4913_v43 = vmul.f32 %v1787_v19, %v4681_v49  ;;  %v4916_v5 = vmul.f32 %v1347_v48, %v4773_v2  ;;  %2662 = vmatpush.bf16.msrb.mxu1 %v3738_v4  ;;  %v3658_v47 = vor.u32 %v4088_v20, %v3657_v44  ;;  %v3522_v6 = vor.u32 %v4054_v42, %v3521_v26  ;;  %v3721_v15 = vld [vmem:[#allocation8 + $0x2b0] sm:$0xf]  ;;  %v4104_v24 = vld [vmem:[#allocation8 + $0x2b4] sm:$0xf0]  ;;  %v3585_v58 = vld [vmem:[#allocation8 + $0x1a0] sm:$0xf] }
 0x13b   :  { %v1368_v49 = vand.u32 2147483647, %v4870_v62  ;;  %v4927_v51 = vor.u32 1.1754944e-38, %v1370_v34  ;;  %v4930_v2 = vmul.f32 %v1627_v10, %v4806_v40  ;;  %v1658_v23 = vmul.f32 2.1237322e-06, %v4910_v25  ;;  %2635 = vmatpush.bf16.msra.mxu3 %v3602_v41 }
 0x13c   :  { %v1327_v31 = vsel %vm4922_vm3, %v4874_v21, %v1323_v38  ;;  %v1669_v18 = vmul.f32 3.8918573e-05, %v4910_v25  ;;  %2650 = vmatpush.bf16.msrb.mxu0 %v3658_v47  ;;  %v3730_v0 = vor.u32 %v4106_v37, %v3729_v14  ;;  %v3594_v11 = vor.u32 %v4072_v57, %v3593_v50  ;;  %v4070_v48 = vld [vmem:[#allocation8 + $0x1a4] sm:$0xf0]  ;;  %v3641_v45 = vld [vmem:[#allocation8 + $0x210] sm:$0xf] }
 0x13d   :  { %v1361_v22 = vsub.f32 1.0, %v1360_v35  ;;  %v1659_v1 = vadd.f32 0.00028619796, %v1658_v23  ;;  %2623 = vmatpush.bf16.msra.mxu2 %v3522_v6  ;;  %v220_v40 = vperm.slane %v4937_v16, 6  ;;  %v3650_v19 = vor.u32 %v4086_v60, %v3649_v59  ;;  %v4084_v53 = vld [vmem:[#allocation8 + $0x214] sm:$0xf0] }
 0x13e   :  { %v4940_v34 = vpop.eup %4176  ;;  %vm1644_vm4 = vweird.f32 %v4894_v30  ;;  %v1670_v21 = vadd.f32 0.001143296, %v1669_v18  ;;  %2663 = vmatpush.bf16.msrb.mxu1 %v3730_v0  ;;  %v3514_v44 = vor.u32 %v4052_v46, %v3513_v8  ;;  %v3722_v20 = vor.u32 %v4104_v24, %v3721_v15  ;;  %v3505_v37 = vld [vmem:[#allocation8 + $0x100] sm:$0xf]  ;;  %v4050_v50 = vld [vmem:[#allocation8 + $0x104] sm:$0xf0]  ;;  %v1085_v15 = vpop.f32.mrf.mxu2 }
 0x13f   :  { %v1332_v54 = vsel %vm4904_vm2, %v1331_v13, %v1327_v31  ;;  %vm1364_vm5 = vweird.f32 %v4870_v62  ;;  %v1640_v26 = vmul.f32 %v4940_v34, %v4894_v30  ;;  %v1648_v42 = vand.u32 2147483647, %v4894_v30  ;;  %2636 = vmatpush.bf16.msra.mxu3 %v3594_v11  ;;  %v3713_v8 = vld [vmem:[#allocation8 + $0x2a0] sm:$0xf]  ;;  %v4102_v47 = vld [vmem:[#allocation8 + $0x2a4] sm:$0xf0]  ;;  %v1059_v0 = vpop.f32.mrf.mxu0 }
 0x140   :  { %v1660_v10 = vmul.f32 %v1659_v1, %v4910_v25  ;;  %v1650_v17 = vand.u32 2147483648, %v4894_v30  ;;  %v1671_v4 = vmul.f32 %v1670_v21, %v4910_v25  ;;  %v1058_v41 = vadd.f32 %v1057_v7, %v220_v40  ;;  %2651 = vmatpush.bf16.msrb.mxu0 %v3650_v19  ;;  %v3577_v24 = vld [vmem:[#allocation8 + $0x190] sm:$0xf]  ;;  %v4068_v27 = vld [vmem:[#allocation8 + $0x194] sm:$0xf0] }
 0x141   :  { %v3586_v14 = vor.u32 %v4070_v48, %v3585_v58  ;;  %v1362_v38 = vmul.f32 %v4898_v12, %v1361_v22  ;;  %v1641_v57 = vsub.f32 1.0, %v1640_v26  ;;  %2624 = vmatpush.bf16.msra.mxu2 %v3514_v44  ;;  %v3642_v60 = vor.u32 %v4084_v53, %v3641_v45  ;;  %v1099_v45 = vpop.f32.mrf.mxu3  ;;  %v4082_v30 = vld [vmem:[#allocation8 + $0x204] sm:$0xf0] }
 0x142   :  { %v1661_v59 = vadd.f32 0.0036580483, %v1660_v10  ;;  %v1333_v32 = vmul.f32 %v1332_v54, %v4883_v3  ;;  %vm1365_vm6 = vweird.f32 %v4898_v12  ;;  %v1672_v13 = vadd.f32 0.014752088, %v1671_v4  ;;  %2664 = vmatpush.bf16.msrb.mxu1 %v3722_v20  ;;  %v3633_v54 = vld [vmem:[#allocation8 + $0x200] sm:$0xf]  ;;  %v1073_v4 = vpop.f32.mrf.mxu1 }
 0x143   :  { %v4957_v35 = vadd.f32 %v1071_v29, %v1058_v41  ;;  %v1642_v6 = vmul.f32 %v4940_v34, %v1641_v57  ;;  %vm1645_vm7 = vweird.f32 %v4940_v34  ;;  %2637 = vmatpush.bf16.msra.mxu3 %v3586_v14  ;;  %v3506_v46 = vor.u32 %v4050_v50, %v3505_v37  ;;  %vm4984_vm10 = vmor %vm1364_vm5, %vm1365_vm6  ;;  %v3817_v50 = vld [vmem:[#allocation8 + $0x370] sm:$0xf] }
 0x144   :  { %v1662_v7 = vmul.f32 %v1661_v59, %v4910_v25  ;;  %v1651_v3 = vor.u32 1.1754944e-38, %v1650_v17  ;;  %v1673_v23 = vmul.f32 %v1672_v13, %v4910_v25  ;;  %2652 = vmatpush.bf16.msrb.mxu0 %v3642_v60  ;;  %v221_v18 = vperm.slane %v4937_v16, 7  ;;  %vm1646_vm8 = vmor %vm1644_vm4, %vm1645_vm7 }
 0x145   :  { %v4964_v31 = vmul.f32 0.70710677, %v4957_v35  ;;  %v1363_v11 = vadd.f32 %v4898_v12, %v1362_v38  ;;  %v1643_v58 = vadd.f32 %v4940_v34, %v1642_v6  ;;  %2625 = vmatpush.bf16.msra.mxu2 %v3506_v46  ;;  %v3714_v1 = vor.u32 %v4102_v47, %v3713_v8  ;;  %v4128_v38 = vld [vmem:[#allocation8 + $0x374] sm:$0xf0] }
 0x146   :  { %v1663_v22 = vadd.f32 0.05243302, %v1662_v7  ;;  %v1674_v19 = vadd.f32 0.112945676, %v1673_v23  ;;  %v1086_v21 = vadd.f32 %v1085_v15, %v221_v18  ;;  %v3578_v29 = vor.u32 %v4068_v27, %v3577_v24 }
 0x147   :  { %v1376_v48 = vmul.f32 %v4964_v31, %v4964_v31  ;;  %v3363_v44 = vclamps-f32 %v1333_v32, 1.0  ;;  %v1647_v20 = vsel %vm1646_vm8, %v4940_v34, %v1643_v58  ;;  %vm1649_vm9 = vcmp.eq.f32.partialorder %v1648_v42, 8.507059e+37  ;;  %2665 = vmatpush.bf16.msrb.mxu1 %v3714_v1  ;;  %v3435_v1 = vld [vmem:[#allocation8 + $0x78] sm:$0xf0] }
 0x148   :  { %v1060_v53 = vadd.f32 %v1059_v0, %v220_v40  ;;  %v1652_v10 = vsel %vm1649_vm9, %v1651_v3, %v1647_v20  ;;  %v1675_v17 = vmul.f32 %v1674_v19, %v4910_v25  ;;  %v4991_v42 = vadd.f32 %v1099_v45, %v1086_v21  ;;  %2638 = vmatpush.bf16.msra.mxu3 %v3578_v29  ;;  %v3705_v21 = vld [vmem:[#allocation8 + $0x290] sm:$0xf]  ;;  %v3569_v29 = vld [vmem:[#allocation8 + $0x180] sm:$0xf] }
 0x149   :  { %v4989_v34 = vmin.f32 %v1376_v48, 16.0  ;;  %2626 = vmatmul.bf16.vlgmr.msra.gmra.mxu2 %v4877_v56  ;;  %v1367_v40 = vsel %vm4984_vm10, %v4898_v12, %v1363_v11  ;;  %v1653_v41 = vmul.f32 %v1652_v10, %v4930_v2  ;;  %v1664_v14 = vmul.f32 %v1663_v22, %v4910_v25  ;;  %v4031_v22 = vld [vmem:[#allocation8 + $0x74] sm:$0xf] }
 0x14a   :  { %v4999_v37 = vadd.f32 %v1073_v4, %v1060_v53  ;;  %v1676_v57 = vadd.f32 0.4994258, %v1675_v17  ;;  %v3634_v32 = vor.u32 %v4082_v30, %v3633_v54  ;;  %v1780_v13 = vadd.f32 1.0, %v3363_v44  ;;  %v4066_v54 = vld [vmem:[#allocation8 + $0x184] sm:$0xf0] }
 0x14b   :  { %v1378_v59 = vmul.f32 2.1237322e-06, %v4989_v34  ;;  %v1389_v60 = vmul.f32 3.8918573e-05, %v4989_v34  ;;  %vm1369_vm11 = vcmp.eq.f32.partialorder %v1368_v49, 8.507059e+37  ;;  %v3371_v8 = vclamps-f32 %v1653_v41, 1.0 }
 0x14c   :  { %v5006_v12 = vmul.f32 0.70710677, %v4991_v42  ;;  %v1372_v2 = vsel %vm1369_vm11, %v4927_v51, %v1367_v40  ;;  %v1677_v47 = vmul.f32 %v1676_v57, %v4910_v25  ;;  %2653 = vmatpush.bf16.msrb.mxu0 %v3634_v32  ;;  %v1665_v15 = vadd.f32 0.18741608, %v1664_v14  ;;  %v3809_v4 = vld [vmem:[#allocation8 + $0x360] sm:$0xf] }
 0x14d   :  { %v1379_v6 = vadd.f32 0.00028619796, %v1378_v59  ;;  %v1390_v7 = vadd.f32 0.001143296, %v1389_v60  ;;  %v1788_v46 = vadd.f32 1.0, %v3371_v8  ;;  %v3818_v51 = vor.u32 %v4128_v38, %v3817_v50 }
 0x14e   :  { %v1416_v24 = vmul.f32 %v5006_v12, %v5006_v12  ;;  %v5013_v27 = vmul.f32 0.70710677, %v4999_v37  ;;  %v5015_v62 = vadd.f32 1.0, %v1677_v47  ;;  %v1796_v23 = vmul.f32 %v1780_v13, %v4856_v36  ;;  %v4100_v36 = vld [vmem:[#allocation8 + $0x294] sm:$0xf0] }
 0x14f   :  { %v1380_v49 = vmul.f32 %v1379_v6, %v4989_v34  ;;  %v1391_v3 = vmul.f32 %v1390_v7, %v4989_v34  ;;  %v1804_v0 = vmul.f32 %v1788_v46, %v4866_v63  ;;  %v1795_v19 = vmul.f32 %v4853_v55, %v4592_v33  ;;  %2674 = vmatpush.bf16.msrb.mxu2 %v3818_v51  ;;  %v4126_v40 = vld [vmem:[#allocation8 + $0x364] sm:$0xf0]  ;;  %v4029_v60 = vld [vmem:[#allocation8 + $0x64] sm:$0xf]  ;;  %v3427_v6 = vld [vmem:[#allocation8 + $0x68] sm:$0xf0] }
 0x150   :  { %v5021_v11 = vmin.f32 %v1416_v24, 16.0  ;;  %v1696_v58 = vmul.f32 %v5013_v27, %v5013_v27  ;;  %v5028_v48 = vmul.f32 %v1372_v2, %v4916_v5  ;;  %4178 = vrcp.f32 %v5015_v62 }
 0x151   :  { %v5031_v63 = vpack.c.bf16 %v1804_v0, %v1796_v23  ;;  %v1381_v44 = vadd.f32 0.0036580483, %v1380_v49  ;;  %v1392_v20 = vadd.f32 0.014752088, %v1391_v3  ;;  %v5035_v53 = vpack.c.bf16 %v4913_v43, %v1795_v19  ;;  %v1087_v19 = vpop.f32.mrf.mxu2 }
 0x152   :  { %v1418_v45 = vmul.f32 2.1237322e-06, %v5021_v11  ;;  %v1666_v33 = vmul.f32 %v1665_v15, %v4910_v25  ;;  %v1429_v55 = vmul.f32 3.8918573e-05, %v5021_v11  ;;  %v5039_v5 = vmin.f32 %v1696_v58, 16.0 }
 0x153   :  { %v1382_v30 = vmul.f32 %v1381_v44, %v4989_v34  ;;  %v1393_v26 = vmul.f32 %v1392_v20, %v4989_v34  ;;  %v3438_v17 = vor.u32 %v4031_v22, %v3435_v1  ;;  %2654 = vmatmul.bf16.vlgmr.msrb.gmra.mxu0 %v5031_v63  ;;  %v3706_v14 = vor.u32 %v4100_v36, %v3705_v21 }
 0x154   :  { %v1419_v10 = vadd.f32 0.00028619796, %v1418_v45  ;;  %v1430_v41 = vadd.f32 0.001143296, %v1429_v55  ;;  %v1698_v43 = vmul.f32 2.1237322e-06, %v5039_v5  ;;  %v3570_v59 = vor.u32 %v4066_v54, %v3569_v29 }
 0x155   :  { %v1709_v25 = vmul.f32 3.8918573e-05, %v5039_v5  ;;  %v3364_v50 = vclamps-f32 %v5028_v48, 1.0  ;;  %v1394_v38 = vadd.f32 0.112945676, %v1393_v26  ;;  %2702 = vmatpush.bf16.msra.mxu0 %v3438_v17  ;;  %2666 = vmatpush.bf16.msrb.mxu1 %v3706_v14  ;;  %v3810_v47 = vor.u32 %v4126_v40, %v3809_v4 }
 0x156   :  { %v1420_v57 = vmul.f32 %v1419_v10, %v5021_v11  ;;  %v4179_v32 = vpop.eup %4178  ;;  %v1431_v13 = vmul.f32 %v1430_v41, %v5021_v11  ;;  %v1699_v8 = vadd.f32 0.00028619796, %v1698_v43  ;;  %v1667_v7 = vadd.f32 1.1283791, %v1666_v33  ;;  %2639 = vmatpush.bf16.msra.mxu3 %v3570_v59  ;;  %v4098_v59 = vld [vmem:[#allocation8 + $0x284] sm:$0xf0] }
 0x157   :  { %v1710_v2 = vadd.f32 0.001143296, %v1709_v25  ;;  %v1680_v46 = vmul.f32 %v4179_v32, %v5015_v62  ;;  %v1383_v15 = vadd.f32 0.05243302, %v1382_v30  ;;  %v1395_v24 = vmul.f32 %v1394_v38, %v4989_v34  ;;  %2675 = vmatpush.bf16.msrb.mxu2 %v3810_v47  ;;  %v4144_v47 = vld [vmem:[#allocation8 + $0x3f4] sm:$0xf0] }
 0x158   :  { %v1421_v49 = vadd.f32 0.0036580483, %v1420_v57  ;;  %v1432_v3 = vadd.f32 0.014752088, %v1431_v13  ;;  %v1700_v51 = vmul.f32 %v1699_v8, %v5039_v5  ;;  %v1688_v58 = vand.u32 2147483647, %v5015_v62 }
 0x159   :  { %v1711_v23 = vmul.f32 %v1710_v2, %v5039_v5  ;;  %v1681_v0 = vsub.f32 1.0, %v1680_v46  ;;  %v1396_v22 = vadd.f32 0.4994258, %v1395_v24  ;;  %v3430_v1 = vor.u32 %v4029_v60, %v3427_v6  ;;  %2640 = vmatmul.bf16.vlgmr.msra.gmra.mxu3 %v5035_v53  ;;  %v3881_v2 = vld [vmem:[#allocation8 + $0x3f0] sm:$0xf] }
 0x15a   :  { %v1690_v21 = vand.u32 2147483648, %v5015_v62  ;;  %v1433_v36 = vmul.f32 %v1432_v3, %v5021_v11  ;;  %v1701_v29 = vadd.f32 0.0036580483, %v1700_v51  ;;  %vm1685_vm12 = vweird.f32 %v4179_v32 }
 0x15b   :  { %v1712_v44 = vadd.f32 0.014752088, %v1711_v23  ;;  %v1682_v20 = vmul.f32 %v4179_v32, %v1681_v0  ;;  %v1397_v45 = vmul.f32 %v1396_v22, %v4989_v34  ;;  %v1422_v33 = vmul.f32 %v1421_v49, %v5021_v11  ;;  %2703 = vmatpush.bf16.msra.mxu0 %v3430_v1 }
 0x15c   :  { %v1384_v55 = vmul.f32 %v1383_v15, %v4989_v34  ;;  %v1434_v54 = vadd.f32 0.112945676, %v1433_v36  ;;  %v1088_v26 = vadd.f32 %v1087_v19, %v221_v18  ;;  %v1668_v10 = vmul.f32 %v1667_v7, %v4890_v52  ;;  %v1101_v18 = vpop.f32.mrf.mxu3  ;;  %v4047_v36 = vld [vmem:[#allocation8 + $0xf4] sm:$0xf] }
 0x15d   :  { %v1713_v30 = vmul.f32 %v1712_v44, %v5039_v5  ;;  %v1683_v17 = vadd.f32 %v4179_v32, %v1682_v20  ;;  %vm1684_vm13 = vweird.f32 %v5015_v62  ;;  %v5065_v4 = vadd.f32 1.0, %v1397_v45  ;;  %v3697_v62 = vld [vmem:[#allocation8 + $0x280] sm:$0xf]  ;;  %v3801_v45 = vld [vmem:[#allocation8 + $0x350] sm:$0xf] }
 0x15e   :  { %vm1686_vm14 = vmor %vm1684_vm13, %vm1685_vm12  ;;  %v1691_v40 = vor.u32 1.1754944e-38, %v1690_v21  ;;  %v1435_v41 = vmul.f32 %v1434_v54, %v5021_v11  ;;  %v1702_v43 = vmul.f32 %v1701_v29, %v5039_v5  ;;  %vm1689_vm15 = vcmp.eq.f32.partialorder %v1688_v58, 8.507059e+37  ;;  %v3419_v54 = vld [vmem:[#allocation8 + $0x58] sm:$0xf0] }
 0x15f   :  { %v1714_v25 = vadd.f32 0.112945676, %v1713_v30  ;;  %v1687_v14 = vsel %vm1686_vm14, %v4179_v32, %v1683_v17  ;;  %4180 = vrcp.f32 %v5065_v4  ;;  %v1423_v16 = vadd.f32 0.05243302, %v1422_v33  ;;  %v4124_v33 = vld [vmem:[#allocation8 + $0x354] sm:$0xf0] }
 0x160   :  { %v1692_v38 = vsel %vm1689_vm15, %v1691_v40, %v1687_v14  ;;  %v1385_v52 = vadd.f32 0.18741608, %v1384_v55  ;;  %v5070_v57 = vadd.f32 %v1101_v18, %v1088_v26  ;;  %v1436_v13 = vadd.f32 0.4994258, %v1435_v41  ;;  %v4027_v55 = vld [vmem:[#allocation8 + $0x54] sm:$0xf] }
 0x161   :  { %v1693_v60 = vmul.f32 %v1692_v38, %v1668_v10  ;;  %v1715_v8 = vmul.f32 %v1714_v25, %v5039_v5  ;;  %v1109_v6 = vmul.f32 0.5, %v4756_v9  ;;  %v1781_v32 = vadd.f32 1.0, %v3364_v50  ;;  %v3873_v25 = vld [vmem:[#allocation8 + $0x3e0] sm:$0xf]  ;;  %v4142_v14 = vld [vmem:[#allocation8 + $0x3e4] sm:$0xf0] }
 0x162   :  { %v1117_v7 = vmul.f32 0.5, %v4872_v39  ;;  %v1703_v46 = vadd.f32 0.05243302, %v1702_v43  ;;  %v1424_v24 = vmul.f32 %v1423_v16, %v5021_v11  ;;  %v1437_v49 = vmul.f32 %v1436_v13, %v5021_v11  ;;  %v4045_v38 = vld [vmem:[#allocation8 + $0xe4] sm:$0xf] }
 0x163   :  { %v3372_v15 = vclamps-f32 %v1693_v60, 1.0  ;;  %v1716_v3 = vadd.f32 0.4994258, %v1715_v8  ;;  %v1386_v51 = vmul.f32 %v1385_v52, %v4989_v34  ;;  %v5081_v23 = vmul.f32 0.70710677, %v5070_v57 }
 0x164   :  { %v3698_v0 = vor.u32 %v4098_v59, %v3697_v62  ;;  %v3882_v58 = vor.u32 %v4144_v47, %v3881_v2  ;;  %v5086_v50 = vmul.f32 0.5, %v4957_v35  ;;  %v5088_v39 = vadd.f32 1.0, %v1437_v49  ;;  %v3499_v35 = vld [vmem:[#allocation8 + $0xf8] sm:$0xf0]  ;;  %v3491_v52 = vld [vmem:[#allocation8 + $0xe8] sm:$0xf0] }
 0x165   :  { %v5083_v9 = vpop.eup %4180  ;;  %v1789_v48 = vadd.f32 1.0, %v3372_v15  ;;  %v1717_v22 = vmul.f32 %v1716_v3, %v5039_v5  ;;  %v5094_v34 = vmul.f32 0.5, %v4999_v37  ;;  %v1704_v19 = vmul.f32 %v1703_v46, %v5039_v5  ;;  %v3793_v62 = vld [vmem:[#allocation8 + $0x340] sm:$0xf]  ;;  %v4122_v59 = vld [vmem:[#allocation8 + $0x344] sm:$0xf0] }
 0x166   :  { %v1400_v1 = vmul.f32 %v5083_v9, %v5065_v4  ;;  %v1736_v21 = vmul.f32 %v5081_v23, %v5081_v23  ;;  %2667 = vmatpush.bf16.msrb.mxu1 %v3698_v0  ;;  %2688 = vmatpush.bf16.msrb.mxu3 %v3882_v58  ;;  %v1797_v29 = vmul.f32 %v1781_v32, %v1109_v6  ;;  %v1425_v20 = vadd.f32 0.18741608, %v1424_v24  ;;  %v4025_v8 = vld [vmem:[#allocation8 + $0x44] sm:$0xf]  ;;  %v3411_v2 = vld [vmem:[#allocation8 + $0x48] sm:$0xf0] }
 0x167   :  { %v1805_v44 = vmul.f32 %v1789_v48, %v1117_v7  ;;  %4182 = vrcp.f32 %v5088_v39  ;;  %v1387_v37 = vadd.f32 1.1283791, %v1386_v51  ;;  %v1408_v26 = vand.u32 2147483647, %v5065_v4  ;;  %v3865_v46 = vld [vmem:[#allocation8 + $0x3d0] sm:$0xf] }
 0x168   :  { %v1401_v30 = vsub.f32 1.0, %v1400_v1  ;;  %v5101_v10 = vadd.f32 1.0, %v1717_v22  ;;  %v1410_v40 = vand.u32 2147483648, %v5065_v4  ;;  %v5106_v41 = vmin.f32 %v1736_v21, 16.0  ;;  %v4140_v15 = vld [vmem:[#allocation8 + $0x3d4] sm:$0xf0] }
 0x169   :  { %v5103_v17 = vpack.c.bf16 %v1805_v44, %v1797_v29  ;;  %v3502_v43 = vor.u32 %v4047_v36, %v3499_v35  ;;  %vm1405_vm0 = vweird.f32 %v5083_v9  ;;  %v1705_v18 = vadd.f32 0.18741608, %v1704_v19  ;;  %v4043_v58 = vld [vmem:[#allocation8 + $0xd4] sm:$0xf]  ;;  %v3483_v48 = vld [vmem:[#allocation8 + $0xd8] sm:$0xf0] }
 0x16a   :  { %v1402_v16 = vmul.f32 %v5083_v9, %v1401_v30  ;;  %4184 = vrcp.f32 %v5101_v10  ;;  %vm1404_vm1 = vweird.f32 %v5065_v4  ;;  %v1426_v60 = vmul.f32 %v1425_v20, %v5021_v11  ;;  %v3785_v19 = vld [vmem:[#allocation8 + $0x330] sm:$0xf]  ;;  %v4120_v21 = vld [vmem:[#allocation8 + $0x334] sm:$0xf0]  ;;  %v4023_v36 = vld [vmem:[#allocation8 + $0x34] sm:$0xf] }
 0x16b   :  { %v1738_v13 = vmul.f32 2.1237322e-06, %v5106_v41  ;;  %2716 = vmatpush.bf16.msra.mxu1 %v3502_v43  ;;  %v1749_v6 = vmul.f32 3.8918573e-05, %v5106_v41  ;;  %v3802_v32 = vor.u32 %v4124_v33, %v3801_v45  ;;  %v3422_v7 = vor.u32 %v4027_v55, %v3419_v54  ;;  %vm5124_vm2 = vmor %vm1404_vm1, %vm1405_vm0  ;;  %v3403_v35 = vld [vmem:[#allocation8 + $0x38] sm:$0xf0] }
 0x16c   :  { %v1403_v47 = vadd.f32 %v5083_v9, %v1402_v16  ;;  %2668 = vmatmul.bf16.vlgmr.msrb.gmra.mxu1 %v5103_v17  ;;  %v1388_v49 = vmul.f32 %v1387_v37, %v4964_v31  ;;  %vm5128_vm3 = vcmp.eq.f32.partialorder %v1408_v26, 8.507059e+37  ;;  %v3874_v0 = vor.u32 %v4142_v14, %v3873_v25  ;;  %v3857_v33 = vld [vmem:[#allocation8 + $0x3c0] sm:$0xf]  ;;  %v4138_v55 = vld [vmem:[#allocation8 + $0x3c4] sm:$0xf0] }
 0x16d   :  { %v5117_v24 = vpop.eup %4182  ;;  %v1739_v51 = vadd.f32 0.00028619796, %v1738_v13  ;;  %v1411_v22 = vor.u32 1.1754944e-38, %v1410_v40  ;;  %v1706_v1 = vmul.f32 %v1705_v18, %v5039_v5  ;;  %v1750_v4 = vadd.f32 0.001143296, %v1749_v6  ;;  %2676 = vmatpush.bf16.msrb.mxu2 %v3802_v32  ;;  %2704 = vmatpush.bf16.msra.mxu0 %v3422_v7 }
 0x16e   :  { %v1407_v31 = vsel %vm5124_vm2, %v5083_v9, %v1403_v47  ;;  %v5136_v29 = vadd.f32 1.1283791, %v1426_v60  ;;  %2689 = vmatpush.bf16.msrb.mxu3 %v3874_v0  ;;  %v3494_v20 = vor.u32 %v4045_v38, %v3491_v52  ;;  %v3794_v45 = vor.u32 %v4122_v59, %v3793_v62  ;;  %v4041_v26 = vld [vmem:[#allocation8 + $0xc4] sm:$0xf]  ;;  %v3475_v40 = vld [vmem:[#allocation8 + $0xc8] sm:$0xf0] }
 0x16f   :  { %v1740_v44 = vmul.f32 %v1739_v51, %v5106_v41  ;;  %v1440_v5 = vmul.f32 %v5117_v24, %v5088_v39  ;;  %v1448_v54 = vand.u32 2147483647, %v5088_v39  ;;  %v1751_v37 = vmul.f32 %v1750_v4, %v5106_v41  ;;  %v3777_v18 = vld [vmem:[#allocation8 + $0x320] sm:$0xf]  ;;  %v4118_v38 = vld [vmem:[#allocation8 + $0x324] sm:$0xf0] }
 0x170   :  { %v5139_v9 = vpop.eup %4184  ;;  %v3414_v30 = vor.u32 %v4025_v8, %v3411_v2  ;;  %v1412_v43 = vsel %vm5128_vm3, %v1411_v22, %v1407_v31  ;;  %2717 = vmatpush.bf16.msra.mxu1 %v3494_v20  ;;  %v3866_v16 = vor.u32 %v4140_v15, %v3865_v46  ;;  %v1707_v52 = vadd.f32 1.1283791, %v1706_v1  ;;  %v4021_v6 = vld [vmem:[#allocation8 + $0x24] sm:$0xf]  ;;  %v3395_v32 = vld [vmem:[#allocation8 + $0x28] sm:$0xf0] }
 0x171   :  { %v1720_v25 = vmul.f32 %v5139_v9, %v5101_v10  ;;  %v1741_v14 = vadd.f32 0.0036580483, %v1740_v44  ;;  %v1728_v62 = vand.u32 2147483647, %v5101_v10  ;;  %v1752_v59 = vadd.f32 0.014752088, %v1751_v37  ;;  %2677 = vmatpush.bf16.msrb.mxu2 %v3794_v45 }
 0x172   :  { %2705 = vmatpush.bf16.msra.mxu0 %v3414_v30  ;;  %v3486_v60 = vor.u32 %v4043_v58, %v3483_v48  ;;  %v1730_v8 = vand.u32 2147483648, %v5101_v10  ;;  %2690 = vmatpush.bf16.msrb.mxu3 %v3866_v16  ;;  %v3786_v2 = vor.u32 %v4120_v21, %v3785_v19  ;;  %v3406_v47 = vor.u32 %v4023_v36, %v3403_v35  ;;  %v3849_v3 = vld [vmem:[#allocation8 + $0x3b0] sm:$0xf]  ;;  %v4136_v51 = vld [vmem:[#allocation8 + $0x3b4] sm:$0xf0] }
 0x173   :  { %v1721_v13 = vsub.f32 1.0, %v1720_v25  ;;  %v1413_v7 = vmul.f32 %v1412_v43, %v1388_v49  ;;  %v1441_v11 = vsub.f32 1.0, %v1440_v5  ;;  %v1753_v46 = vmul.f32 %v1752_v59, %v5106_v41  ;;  %v4039_v31 = vld [vmem:[#allocation8 + $0xb4] sm:$0xf]  ;;  %v3467_v22 = vld [vmem:[#allocation8 + $0xb8] sm:$0xf0] }
 0x174   :  { %v3858_v15 = vor.u32 %v4138_v55, %v3857_v33  ;;  %vm1725_vm4 = vweird.f32 %v5139_v9  ;;  %v1742_v58 = vmul.f32 %v1741_v14, %v5106_v41  ;;  %2718 = vmatpush.bf16.msra.mxu1 %v3486_v60  ;;  %v3478_v48 = vor.u32 %v4041_v26, %v3475_v40  ;;  %v3769_v1 = vld [vmem:[#allocation8 + $0x310] sm:$0xf]  ;;  %v4116_v36 = vld [vmem:[#allocation8 + $0x314] sm:$0xf0]  ;;  %v4019_v45 = vld [vmem:[#allocation8 + $0x14] sm:$0xf] }
 0x175   :  { %v1722_v0 = vmul.f32 %v5139_v9, %v1721_v13  ;;  %v1450_v4 = vand.u32 2147483648, %v5088_v39  ;;  %v1754_v49 = vadd.f32 0.112945676, %v1753_v46  ;;  %2678 = vmatpush.bf16.msrb.mxu2 %v3786_v2  ;;  %v3778_v19 = vor.u32 %v4118_v38, %v3777_v18  ;;  %v3387_v33 = vld [vmem:[#allocation8 + $0x18] sm:$0xf0] }
 0x176   :  { %2706 = vmatpush.bf16.msra.mxu0 %v3406_v47  ;;  %v3398_v21 = vor.u32 %v4021_v6, %v3395_v32  ;;  %v1708_v35 = vmul.f32 %v1707_v52, %v5013_v27  ;;  %vm1724_vm5 = vweird.f32 %v5101_v10  ;;  %2691 = vmatpush.bf16.msrb.mxu3 %v3858_v15  ;;  %v3850_v20 = vor.u32 %v4136_v51, %v3849_v3  ;;  %v3841_v55 = vld [vmem:[#allocation8 + $0x3a0] sm:$0xf]  ;;  %v4134_v26 = vld [vmem:[#allocation8 + $0x3a4] sm:$0xf0]  ;;  %v4037_v25 = vld [vmem:[#allocation8 + $0xa4] sm:$0xf] }
 0x177   :  { %v1723_v44 = vadd.f32 %v5139_v9, %v1722_v0  ;;  %v3365_v5 = vclamps-f32 %v1413_v7, 1.0  ;;  %vm1726_vm6 = vmor %vm1724_vm5, %vm1725_vm4  ;;  %vm1729_vm7 = vcmp.eq.f32.partialorder %v1728_v62, 8.507059e+37  ;;  %v1731_v37 = vor.u32 1.1754944e-38, %v1730_v8  ;;  %v3459_v14 = vld [vmem:[#allocation8 + $0xa8] sm:$0xf0] }
 0x178   :  { %v1755_v30 = vmul.f32 %v1754_v49, %v5106_v41  ;;  %v1442_v27 = vmul.f32 %v5117_v24, %v1441_v11  ;;  %v1743_v43 = vadd.f32 0.05243302, %v1742_v58  ;;  %2719 = vmatpush.bf16.msra.mxu1 %v3478_v48  ;;  %v3470_v10 = vor.u32 %v4039_v31, %v3467_v22  ;;  %v3761_v62 = vld [vmem:[#allocation8 + $0x300] sm:$0xf]  ;;  %v4114_v59 = vld [vmem:[#allocation8 + $0x304] sm:$0xf0] }
 0x179   :  { %v1727_v40 = vsel %vm1726_vm6, %v5139_v9, %v1723_v44  ;;  %2679 = vmatpush.bf16.msrb.mxu2 %v3778_v19  ;;  %v3770_v38 = vor.u32 %v4116_v36, %v3769_v1  ;;  %v3390_v52 = vor.u32 %v4019_v45, %v3387_v33  ;;  %v3842_v13 = vor.u32 %v4134_v26, %v3841_v55  ;;  %v4017_v8 = vld [vmem:[#allocation8 + $0x4] sm:$0xf]  ;;  %v3379_v2 = vld [vmem:[#allocation8 + $0x8] sm:$0xf0]  ;;  %v4063_v47 = vld [vmem:[#allocation8 + $0x174] sm:$0xf] }
 0x17a   :  { %v1732_v16 = vsel %vm1729_vm7, %v1731_v37, %v1727_v40  ;;  %v1756_v18 = vadd.f32 0.4994258, %v1755_v30  ;;  %2707 = vmatpush.bf16.msra.mxu0 %v3398_v21  ;;  %2692 = vmatpush.bf16.msrb.mxu3 %v3850_v20  ;;  %vm1445_vm8 = vweird.f32 %v5117_v24  ;;  %v3563_v6 = vld [vmem:[#allocation8 + $0x178] sm:$0xf0]  ;;  %v4095_v32 = vld [vmem:[#allocation8 + $0x274] sm:$0xf]  ;;  %v1744_v15 = vmul.f32 %v1743_v43, %v5106_v41 }
 0x17b   :  { %v1733_v60 = vmul.f32 %v1732_v16, %v1708_v35  ;;  %v3691_v7 = vld [vmem:[#allocation8 + $0x278] sm:$0xf0]  ;;  %v1782_v11 = vadd.f32 1.0, %v3365_v5  ;;  %v3462_v3 = vor.u32 %v4037_v25, %v3459_v14  ;;  %v3833_v51 = vld [vmem:[#allocation8 + $0x390] sm:$0xf]  ;;  %v1443_v58 = vadd.f32 %v5117_v24, %v1442_v27 }
 0x17c   :  { %v1757_v9 = vmul.f32 %v1756_v18, %v5106_v41  ;;  %2720 = vmatpush.bf16.msra.mxu1 %v3470_v10  ;;  %v4132_v0 = vld [vmem:[#allocation8 + $0x394] sm:$0xf0]  ;;  %v3762_v31 = vor.u32 %v4114_v59, %v3761_v62  ;;  %v3382_v22 = vor.u32 %v4017_v8, %v3379_v2  ;;  %v4035_v1 = vld [vmem:[#allocation8 + $0x94] sm:$0xf]  ;;  %v3451_v49 = vld [vmem:[#allocation8 + $0x98] sm:$0xf0]  ;;  %v3566_v36 = vor.u32 %v4063_v47, %v3563_v6 }
 0x17d   :  { %v3373_v46 = vclamps-f32 %v1733_v60, 1.0  ;;  %2680 = vmatpush.bf16.msrb.mxu2 %v3770_v38  ;;  %v1451_v19 = vor.u32 1.1754944e-38, %v1450_v4  ;;  %v3694_v35 = vor.u32 %v4095_v32, %v3691_v7  ;;  %v4061_v44 = vld [vmem:[#allocation8 + $0x164] sm:$0xf]  ;;  %v3555_v20 = vld [vmem:[#allocation8 + $0x168] sm:$0xf0]  ;;  %vm1444_vm9 = vweird.f32 %v5088_v39 }
 0x17e   :  { %v5168_v48 = vadd.f32 1.0, %v1757_v9  ;;  %2708 = vmatpush.bf16.msra.mxu0 %v3390_v52  ;;  %2693 = vmatpush.bf16.msrb.mxu3 %v3842_v13  ;;  %v3834_v45 = vor.u32 %v4132_v0, %v3833_v51  ;;  %v4093_v33 = vld [vmem:[#allocation8 + $0x264] sm:$0xf]  ;;  %v3683_v55 = vld [vmem:[#allocation8 + $0x268] sm:$0xf0]  ;;  %v1798_v37 = vmul.f32 %v1782_v11, %v5086_v50  ;;  %vm5175_vm10 = vmor %vm1444_vm9, %vm1445_vm8  ;;  %v3454_v27 = vor.u32 %v4035_v1, %v3451_v49 }
 0x17f   :  { %v1790_v21 = vadd.f32 1.0, %v3373_v46  ;;  %v3825_v5 = vld [vmem:[#allocation8 + $0x380] sm:$0xf]  ;;  %v1745_v26 = vadd.f32 0.18741608, %v1744_v15  ;;  %v1447_v10 = vsel %vm5175_vm10, %v5117_v24, %v1443_v58  ;;  %v3558_v18 = vor.u32 %v4061_v44, %v3555_v20 }
 0x180   :  { %4186 = vrcp.f32 %v5168_v48  ;;  %2721 = vmatpush.bf16.msra.mxu1 %v3462_v3  ;;  %v4130_v40 = vld [vmem:[#allocation8 + $0x384] sm:$0xf0]  ;;  %v4033_v43 = vld [vmem:[#allocation8 + $0x84] sm:$0xf]  ;;  %v3443_v50 = vld [vmem:[#allocation8 + $0x88] sm:$0xf0]  ;;  %v1428_v6 = vmul.f32 %v5136_v29, %v5006_v12  ;;  %vm1764_vm13 = vweird.f32 %v5168_v48 }
 0x181   :  { %v1806_v30 = vmul.f32 %v1790_v21, %v5094_v34  ;;  %2681 = vmatpush.bf16.msrb.mxu2 %v3762_v31  ;;  %v4079_v25 = vld [vmem:[#allocation8 + $0x1f4] sm:$0xf]  ;;  %v3627_v14 = vld [vmem:[#allocation8 + $0x1f8] sm:$0xf0]  ;;  %v3686_v34 = vor.u32 %v4093_v33, %v3683_v55  ;;  %v3826_v59 = vor.u32 %v4130_v40, %v3825_v5  ;;  %vm1449_vm11 = vcmp.eq.f32.partialorder %v1448_v54, 8.507059e+37 }
 0x182   :  { %2709 = vmatpush.bf16.msra.mxu0 %v3382_v22  ;;  %v4111_v38 = vld [vmem:[#allocation8 + $0x2f4] sm:$0xf]  ;;  %v3755_v52 = vld [vmem:[#allocation8 + $0x2f8] sm:$0xf0]  ;;  %2694 = vmatpush.bf16.msrb.mxu3 %v3834_v45  ;;  %v1746_v24 = vmul.f32 %v1745_v26, %v5106_v41  ;;  %v3446_v2 = vor.u32 %v4033_v43, %v3443_v50  ;;  %v3630_v47 = vor.u32 %v4079_v25, %v3627_v14  ;;  %v4077_v11 = vld [vmem:[#allocation8 + $0x1e4] sm:$0xf] }
 0x183   :  { %v5183_v16 = vpack.c.bf16 %v1806_v30, %v1798_v37  ;;  %v4059_v62 = vld [vmem:[#allocation8 + $0x154] sm:$0xf]  ;;  %v3547_v60 = vld [vmem:[#allocation8 + $0x158] sm:$0xf0]  ;;  %v1452_v32 = vsel %vm1449_vm11, %v1451_v19, %v1447_v10  ;;  %v3758_v7 = vor.u32 %v4111_v38, %v3755_v52  ;;  %v3619_v46 = vld [vmem:[#allocation8 + $0x1e8] sm:$0xf0] }
 0x184   :  { %v4091_v13 = vld [vmem:[#allocation8 + $0x254] sm:$0xf]  ;;  %v3675_v8 = vld [vmem:[#allocation8 + $0x258] sm:$0xf0]  ;;  %2722 = vmatpush.bf16.msra.mxu1 %v3454_v27  ;;  %v3550_v41 = vor.u32 %v4059_v62, %v3547_v60  ;;  %v4109_v15 = vld [vmem:[#allocation8 + $0x2e4] sm:$0xf]  ;;  %v1453_v29 = vmul.f32 %v1452_v32, %v1428_v6  ;;  %v3622_v22 = vor.u32 %v4077_v11, %v3619_v46 }
 0x185   :  { %2730 = vmatpush.bf16.msra.mxu2 %v3566_v36  ;;  %2710 = vmatmul.bf16.vlgmr.msra.gmra.mxu0 %v4687_v61  ;;  %v3678_v54 = vor.u32 %v4091_v13, %v3675_v8  ;;  %v3747_v61 = vld [vmem:[#allocation8 + $0x2e8] sm:$0xf0]  ;;  %v4057_v3 = vld [vmem:[#allocation8 + $0x144] sm:$0xf]  ;;  %v1747_v58 = vadd.f32 1.1283791, %v1746_v24 }
 0x186   :  { %2758 = vmatpush.bf16.msrb.mxu0 %v3694_v35  ;;  %v5189_v9 = vpop.eup %4186  ;;  %2682 = vmatmul.bf16.vlgmr.msrb.gmra.mxu2 %v5183_v16  ;;  %v3539_v51 = vld [vmem:[#allocation8 + $0x148] sm:$0xf0]  ;;  %v4089_v0 = vld [vmem:[#allocation8 + $0x244] sm:$0xf]  ;;  %v4075_v1 = vld [vmem:[#allocation8 + $0x1d4] sm:$0xf]  ;;  %v3750_v21 = vor.u32 %v4109_v15, %v3747_v61 }
 0x187   :  { %v1760_v39 = vmul.f32 %v5189_v9, %v5168_v48  ;;  %2695 = vmatpush.bf16.msrb.mxu3 %v3826_v59  ;;  %v3667_v12 = vld [vmem:[#allocation8 + $0x248] sm:$0xf0]  ;;  %v1768_v49 = vand.u32 2147483647, %v5168_v48  ;;  %v1770_v19 = vand.u32 2147483648, %v5168_v48  ;;  %vm1765_vm12 = vweird.f32 %v5189_v9 }
 0x188   :  { %2723 = vmatpush.bf16.msra.mxu1 %v3446_v2  ;;  %v3611_v36 = vld [vmem:[#allocation8 + $0x1d8] sm:$0xf0]  ;;  %v3542_v44 = vor.u32 %v4057_v3, %v3539_v51  ;;  %v3670_v20 = vor.u32 %v4089_v0, %v3667_v12  ;;  %v4107_v45 = vld [vmem:[#allocation8 + $0x2d4] sm:$0xf]  ;;  %v3366_v30 = vclamps-f32 %v1453_v29, 1.0  ;;  %v1748_v40 = vmul.f32 %v1747_v58, %v5081_v23  ;;  %vm5206_vm14 = vmor %vm1764_vm13, %vm1765_vm12 }
 0x189   :  { %2731 = vmatpush.bf16.msra.mxu2 %v3558_v18  ;;  %v1761_v31 = vsub.f32 1.0, %v1760_v39  ;;  %v3739_v33 = vld [vmem:[#allocation8 + $0x2d8] sm:$0xf0]  ;;  %v4055_v55 = vld [vmem:[#allocation8 + $0x134] sm:$0xf]  ;;  %v3614_v27 = vor.u32 %v4075_v1, %v3611_v36  ;;  %vm1769_vm15 = vcmp.eq.f32.partialorder %v1768_v49, 8.507059e+37 }
 0x18a   :  { %2759 = vmatpush.bf16.msrb.mxu0 %v3686_v34  ;;  %v3531_v5 = vld [vmem:[#allocation8 + $0x138] sm:$0xf0]  ;;  %v4087_v37 = vld [vmem:[#allocation8 + $0x234] sm:$0xf]  ;;  %v1771_v10 = vor.u32 1.1754944e-38, %v1770_v19  ;;  %v3742_v50 = vor.u32 %v4107_v45, %v3739_v33  ;;  %v1783_v13 = vadd.f32 1.0, %v3366_v30 }
 0x18b   :  { %2744 = vmatpush.bf16.msra.mxu3 %v3630_v47  ;;  %v1762_v35 = vmul.f32 %v5189_v9, %v1761_v31  ;;  %v3659_v4 = vld [vmem:[#allocation8 + $0x238] sm:$0xf0]  ;;  %2724 = vmatmul.bf16.vlgmr.msra.gmra.mxu1 %v4784_v28  ;;  %v4073_v28 = vld [vmem:[#allocation8 + $0x1c4] sm:$0xf]  ;;  %v3603_v25 = vld [vmem:[#allocation8 + $0x1c8] sm:$0xf0]  ;;  %v3534_v14 = vor.u32 %v4055_v55, %v3531_v5 }
 0x18c   :  { %2772 = vmatpush.bf16.msrb.mxu1 %v3758_v7  ;;  %v3662_v23 = vor.u32 %v4087_v37, %v3659_v4  ;;  %v4105_v18 = vld [vmem:[#allocation8 + $0x2c4] sm:$0xf]  ;;  %v3731_v34 = vld [vmem:[#allocation8 + $0x2c8] sm:$0xf0]  ;;  %v3606_v24 = vor.u32 %v4073_v28, %v3603_v25  ;;  %v4071_v47 = vld [vmem:[#allocation8 + $0x1b4] sm:$0xf] }
 0x18d   :  { %2732 = vmatpush.bf16.msra.mxu2 %v3550_v41  ;;  %v1763_v26 = vadd.f32 %v5189_v9, %v1762_v35  ;;  %v4053_v38 = vld [vmem:[#allocation8 + $0x124] sm:$0xf]  ;;  %v3523_v62 = vld [vmem:[#allocation8 + $0x128] sm:$0xf0]  ;;  %v3734_v2 = vor.u32 %v4105_v18, %v3731_v34  ;;  %v3595_v6 = vld [vmem:[#allocation8 + $0x1b8] sm:$0xf0] }
 0x18e   :  { %2760 = vmatpush.bf16.msrb.mxu0 %v3678_v54  ;;  %v4085_v59 = vld [vmem:[#allocation8 + $0x224] sm:$0xf]  ;;  %v3651_v60 = vld [vmem:[#allocation8 + $0x228] sm:$0xf0]  ;;  %v1111_v32 = vmul.f32 0.5, %v4991_v42  ;;  %v3526_v11 = vor.u32 %v4053_v38, %v3523_v62  ;;  %v1119_v3 = vmul.f32 0.5, %v5070_v57  ;;  %v3598_v0 = vor.u32 %v4071_v47, %v3595_v6 }
 0x18f   :  { %2745 = vmatpush.bf16.msra.mxu3 %v3622_v22  ;;  %v1767_v48 = vsel %vm5206_vm14, %v5189_v9, %v1763_v26  ;;  %v4103_v9 = vld [vmem:[#allocation8 + $0x2b4] sm:$0xf]  ;;  %v3654_v46 = vor.u32 %v4085_v59, %v3651_v60  ;;  %v3723_v39 = vld [vmem:[#allocation8 + $0x2b8] sm:$0xf0]  ;;  %v4069_v58 = vld [vmem:[#allocation8 + $0x1a4] sm:$0xf] }
 0x190   :  { %2773 = vmatpush.bf16.msrb.mxu1 %v3750_v21  ;;  %v1772_v52 = vsel %vm1769_vm15, %v1771_v10, %v1767_v48  ;;  %v4051_v41 = vld [vmem:[#allocation8 + $0x114] sm:$0xf]  ;;  %v3515_v54 = vld [vmem:[#allocation8 + $0x118] sm:$0xf0]  ;;  %v1799_v12 = vmul.f32 %v1783_v13, %v1111_v32  ;;  %v3726_v29 = vor.u32 %v4103_v9, %v3723_v39  ;;  %v3587_v42 = vld [vmem:[#allocation8 + $0x1a8] sm:$0xf0] }
 0x191   :  { %2733 = vmatpush.bf16.msra.mxu2 %v3542_v44  ;;  %v1773_v8 = vmul.f32 %v1772_v52, %v1748_v40  ;;  %v4083_v15 = vld [vmem:[#allocation8 + $0x214] sm:$0xf]  ;;  %v3643_v61 = vld [vmem:[#allocation8 + $0x218] sm:$0xf0]  ;;  %v3518_v22 = vor.u32 %v4051_v41, %v3515_v54  ;;  %v4101_v49 = vld [vmem:[#allocation8 + $0x2a4] sm:$0xf] }
 0x192   :  { %2761 = vmatpush.bf16.msrb.mxu0 %v3670_v20  ;;  %v3646_v1 = vor.u32 %v4083_v15, %v3643_v61  ;;  %v3715_v19 = vld [vmem:[#allocation8 + $0x2a8] sm:$0xf0]  ;;  %v4049_v21 = vld [vmem:[#allocation8 + $0x104] sm:$0xf]  ;;  %v3590_v20 = vor.u32 %v4069_v58, %v3587_v42  ;;  %v4127_v45 = vld [vmem:[#allocation8 + $0x374] sm:$0xf] }
 0x193   :  { %2746 = vmatpush.bf16.msra.mxu3 %v3614_v27  ;;  %v3374_v7 = vclamps-f32 %v1773_v8, 1.0  ;;  %v3507_v36 = vld [vmem:[#allocation8 + $0x108] sm:$0xf0]  ;;  %v4081_v35 = vld [vmem:[#allocation8 + $0x204] sm:$0xf]  ;;  %v3718_v55 = vor.u32 %v4101_v49, %v3715_v19 }
 0x194   :  { %2774 = vmatpush.bf16.msrb.mxu1 %v3742_v50  ;;  %v3635_v44 = vld [vmem:[#allocation8 + $0x208] sm:$0xf0]  ;;  %v3819_v33 = vld [vmem:[#allocation8 + $0x378] sm:$0xf0]  ;;  %v4067_v5 = vld [vmem:[#allocation8 + $0x194] sm:$0xf]  ;;  %v3510_v4 = vor.u32 %v4049_v21, %v3507_v36 }
 0x195   :  { %2734 = vmatpush.bf16.msra.mxu2 %v3534_v14  ;;  %v1791_v51 = vadd.f32 1.0, %v3374_v7  ;;  %v3579_v37 = vld [vmem:[#allocation8 + $0x198] sm:$0xf0]  ;;  %v3638_v30 = vor.u32 %v4081_v35, %v3635_v44  ;;  %v4099_v26 = vld [vmem:[#allocation8 + $0x294] sm:$0xf]  ;;  %v3822_v40 = vor.u32 %v4127_v45, %v3819_v33  ;;  %v2599_v33 = vpop.f32.mrf.mxu0 }
 0x196   :  { %2762 = vmatpush.bf16.msrb.mxu0 %v3662_v23  ;;  %v3707_v27 = vld [vmem:[#allocation8 + $0x298] sm:$0xf0]  ;;  %v3582_v43 = vor.u32 %v4067_v5, %v3579_v37  ;;  %v4125_v10 = vld [vmem:[#allocation8 + $0x364] sm:$0xf]  ;;  %v3811_v50 = vld [vmem:[#allocation8 + $0x368] sm:$0xf0] }
 0x197   :  { %2747 = vmatpush.bf16.msra.mxu3 %v3606_v24  ;;  %v1807_v31 = vmul.f32 %v1791_v51, %v1119_v3  ;;  %v3710_v28 = vor.u32 %v4099_v26, %v3707_v27  ;;  %v4065_v25 = vld [vmem:[#allocation8 + $0x184] sm:$0xf]  ;;  %v3571_v48 = vld [vmem:[#allocation8 + $0x188] sm:$0xf0]  ;;  %v4143_v18 = vld [vmem:[#allocation8 + $0x3f4] sm:$0xf]  ;;  %v3814_v38 = vor.u32 %v4125_v10, %v3811_v50 }
 0x198   :  { %2775 = vmatpush.bf16.msrb.mxu1 %v3734_v2  ;;  %v4097_v14 = vld [vmem:[#allocation8 + $0x284] sm:$0xf]  ;;  %v3699_v23 = vld [vmem:[#allocation8 + $0x288] sm:$0xf0]  ;;  %v3883_v34 = vld [vmem:[#allocation8 + $0x3f8] sm:$0xf0]  ;;  %v3574_v52 = vor.u32 %v4065_v25, %v3571_v48 }
 0x199   :  { %2735 = vmatpush.bf16.msra.mxu2 %v3526_v11  ;;  %v5215_v57 = vpack.c.bf16 %v1807_v31, %v1799_v12  ;;  %v4123_v62 = vld [vmem:[#allocation8 + $0x354] sm:$0xf]  ;;  %v3803_v59 = vld [vmem:[#allocation8 + $0x358] sm:$0xf0]  ;;  %v3702_v60 = vor.u32 %v4097_v14, %v3699_v23  ;;  %v3886_v13 = vor.u32 %v4143_v18, %v3883_v34  ;;  %v4141_v8 = vld [vmem:[#allocation8 + $0x3e4] sm:$0xf] }
 0x19a   :  { %2763 = vmatpush.bf16.msrb.mxu0 %v3654_v46  ;;  %v3875_v24 = vld [vmem:[#allocation8 + $0x3e8] sm:$0xf0]  ;;  %v3806_v2 = vor.u32 %v4123_v62, %v3803_v59  ;;  %v4121_v47 = vld [vmem:[#allocation8 + $0x344] sm:$0xf]  ;;  %v4139_v32 = vld [vmem:[#allocation8 + $0x3d4] sm:$0xf] }
 0x19b   :  { %2748 = vmatpush.bf16.msra.mxu3 %v3598_v0  ;;  %v3795_v6 = vld [vmem:[#allocation8 + $0x348] sm:$0xf0]  ;;  %v3878_v9 = vor.u32 %v4141_v8, %v3875_v24  ;;  %v3867_v7 = vld [vmem:[#allocation8 + $0x3d8] sm:$0xf0]  ;;  %v4137_v41 = vld [vmem:[#allocation8 + $0x3c4] sm:$0xf] }
 0x19c   :  { %2776 = vmatpush.bf16.msrb.mxu1 %v3726_v29  ;;  %2696 = vmatmul.bf16.vlgmr.msrb.gmra.mxu3 %v5215_v57  ;;  %v3798_v11 = vor.u32 %v4121_v47, %v3795_v6  ;;  %v3787_v46 = vld [vmem:[#allocation8 + $0x338] sm:$0xf0]  ;;  %v3870_v39 = vor.u32 %v4139_v32, %v3867_v7  ;;  %v4117_v15 = vld [vmem:[#allocation8 + $0x324] sm:$0xf]  ;;  %v3779_v61 = vld [vmem:[#allocation8 + $0x328] sm:$0xf0] }
 0x19d   :  { %2736 = vmatpush.bf16.msra.mxu2 %v3518_v22  ;;  %v4135_v51 = vld [vmem:[#allocation8 + $0x3b4] sm:$0xf]  ;;  %v3851_v0 = vld [vmem:[#allocation8 + $0x3b8] sm:$0xf0]  ;;  %v3782_v12 = vor.u32 %v4117_v15, %v3779_v61  ;;  %v4133_v42 = vld [vmem:[#allocation8 + $0x3a4] sm:$0xf] }
 0x19e   :  { %2764 = vmatpush.bf16.msrb.mxu0 %v3646_v1  ;;  %v4115_v29 = vld [vmem:[#allocation8 + $0x314] sm:$0xf]  ;;  %v3854_v58 = vor.u32 %v4135_v51, %v3851_v0  ;;  %v3843_v31 = vld [vmem:[#allocation8 + $0x3a8] sm:$0xf0]  ;;  %v4113_v1 = vld [vmem:[#allocation8 + $0x304] sm:$0xf] }
 0x19f   :  { %2749 = vmatpush.bf16.msra.mxu3 %v3590_v20  ;;  %v3763_v49 = vld [vmem:[#allocation8 + $0x308] sm:$0xf0]  ;;  %v4131_v19 = vld [vmem:[#allocation8 + $0x394] sm:$0xf]  ;;  %v3835_v21 = vld [vmem:[#allocation8 + $0x398] sm:$0xf0] }
 0x1a0   :  { %2777 = vmatpush.bf16.msrb.mxu1 %v3718_v55  ;;  %v3766_v36 = vor.u32 %v4113_v1, %v3763_v49  ;;  %v3838_v35 = vor.u32 %v4131_v19, %v3835_v21  ;;  %v4129_v44 = vld [vmem:[#allocation8 + $0x384] sm:$0xf]  ;;  %v3827_v20 = vld [vmem:[#allocation8 + $0x388] sm:$0xf0]  ;;  %v2613_v55 = vpop.f32.mrf.mxu1  ;;  %v1944_v37 = vld [vmem:[%s5234_s4] sm:$0x3] }
 0x1a1   :  { %2737 = vmatpush.bf16.msra.mxu2 %v3510_v4  ;;  %v3830_v45 = vor.u32 %v4129_v44, %v3827_v20  ;;  %v2601_v4 = vpop.f32.mrf.mxu0  ;;  %v1946_v26 = vperm.slane %v1944_v37, 0  ;;  %s4325_s4 = smov [#allocation10]  }
 0x1a2   :  { %2765 = vmatpush.bf16.msrb.mxu0 %v3638_v30  ;;  %s2822_s15 = sshll.u32 %s4325_s4, 4  ;;  %s2823_s15 = int_to_ptr.vmem [resolvable:$true] %s2822_s15 }
 0x1a3   :  { %2750 = vmatpush.bf16.msra.mxu3 %v3582_v43  ;;  %v2600_v43 = vadd.f32 %v2599_v33, %v1946_v26  ;;  %v2602_v14 = vadd.f32 %v2601_v4, %v1946_v26 }
 0x1a4   :  { %2778 = vmatpush.bf16.msrb.mxu1 %v3710_v28  ;;  %2738 = vmatmul.bf16.vlgmr.msra.gmra.mxu2 %v4877_v56  ;;  %v3859_v56 = vld [vmem:[#allocation8 + $0x3c8] sm:$0xf0] }
 0x1a5   :  { %2786 = vmatpush.bf16.msrb.mxu2 %v3822_v40  ;;  %2766 = vmatmul.bf16.vlgmr.msrb.gmra.mxu0 %v5031_v63  ;;  %v4119_v63 = vld [vmem:[#allocation8 + $0x334] sm:$0xf]  ;;  %v3862_v3 = vor.u32 %v4137_v41, %v3859_v56  ;;  %v2614_v10 = vadd.f32 %v2613_v55, %v2600_v43 }
 0x1a6   :  { %v3790_v54 = vor.u32 %v4119_v63, %v3787_v46  ;;  %v1947_v46 = vperm.slane %v1944_v37, 1 }
 0x1a7   :  { %2751 = vmatpush.bf16.msra.mxu3 %v3574_v52 }
 0x1a8   :  { %2779 = vmatpush.bf16.msrb.mxu1 %v3702_v60  ;;  %v2615_v27 = vpop.f32.mrf.mxu1 }
 0x1a9   :  { %2787 = vmatpush.bf16.msrb.mxu2 %v3814_v38  ;;  %v2616_v18 = vadd.f32 %v2615_v27, %v2602_v14 }
 0x1ab   :  { %2800 = vmatpush.bf16.msrb.mxu3 %v3886_v13  ;;  %2780 = vmatmul.bf16.vlgmr.msrb.gmra.mxu1 %v5103_v17  ;;  %v3771_v17 = vld [vmem:[#allocation8 + $0x318] sm:$0xf0] }
 0x1ac   :  { %2752 = vmatmul.bf16.vlgmr.msra.gmra.mxu3 %v5035_v53  ;;  %v3774_v22 = vor.u32 %v4115_v29, %v3771_v17  ;;  %v3846_v53 = vor.u32 %v4133_v42, %v3843_v31 }
 0x1ad   :  { %2788 = vmatpush.bf16.msrb.mxu2 %v3806_v2 }
 0x1af   :  { %2801 = vmatpush.bf16.msrb.mxu3 %v3878_v9 }
 0x1b1   :  { %2789 = vmatpush.bf16.msrb.mxu2 %v3798_v11 }
 0x1b3   :  { %2802 = vmatpush.bf16.msrb.mxu3 %v3870_v39 }
 0x1b5   :  { %2790 = vmatpush.bf16.msrb.mxu2 %v3790_v54 }
 0x1b7   :  { %2803 = vmatpush.bf16.msrb.mxu3 %v3862_v3 }
 0x1b9   :  { %2791 = vmatpush.bf16.msrb.mxu2 %v3782_v12 }
 0x1bb   :  { %2804 = vmatpush.bf16.msrb.mxu3 %v3854_v58 }
 0x1bd   :  { %2792 = vmatpush.bf16.msrb.mxu2 %v3774_v22 }
 0x1bf   :  { %2805 = vmatpush.bf16.msrb.mxu3 %v3846_v53 }
 0x1c1   :  { %2793 = vmatpush.bf16.msrb.mxu2 %v3766_v36 }
 0x1c3   :  { %2806 = vmatpush.bf16.msrb.mxu3 %v3838_v35 }
 0x1c4   :  { %2794 = vmatmul.bf16.vlgmr.msrb.gmra.mxu2 %v5183_v16 }
 0x1c7   :  { %2807 = vmatpush.bf16.msrb.mxu3 %v3830_v45 }
 0x1ca   :  { %2808 = vmatmul.bf16.vlgmr.msrb.gmra.mxu3 %v5215_v57 }
 0x1cc   :  { %v2627_v5 = vpop.f32.mrf.mxu2 }
 0x1cd   :  { %v2628_v28 = vadd.f32 %v2627_v5, %v2614_v10 }
 0x1d0   :  { %v2655_v50 = vpop.f32.mrf.mxu0 }
 0x1d4   :  { %v2629_v40 = vpop.f32.mrf.mxu2 }
 0x1d5   :  { %v2630_v38 = vadd.f32 %v2629_v40, %v2616_v18 }
 0x1d8   :  { %v2657_v62 = vpop.f32.mrf.mxu0 }
 0x1dc   :  { %v2641_v30 = vpop.f32.mrf.mxu3 }
 0x1dd   :  { %v2642_v48 = vadd.f32 %v2641_v30, %v2628_v28 }
 0x1df   :  { %v2656_v23 = vadd.f32 %v2655_v50, %v2642_v48 }
 0x1e4   :  { %v2643_v16 = vpop.f32.mrf.mxu3 }
 0x1e5   :  { %v2644_v60 = vadd.f32 %v2643_v16, %v2630_v38 }
 0x1e7   :  { %v2658_v24 = vadd.f32 %v2657_v62, %v2644_v60 }
 0x1e9   :  { %v2669_v25 = vpop.f32.mrf.mxu1 }
 0x1ea   :  { %v2670_v34 = vadd.f32 %v2669_v25, %v2656_v23 }
 0x1f1   :  { %v2671_v8 = vpop.f32.mrf.mxu1 }
 0x1f2   :  { %v2672_v47 = vadd.f32 %v2671_v8, %v2658_v24 }
 0x202   :  { %v2711_v7 = vpop.f32.mrf.mxu0 }
 0x203   :  { %v2712_v56 = vadd.f32 %v2711_v7, %v1947_v46 }
 0x208   :  { %v2725_v11 = vpop.f32.mrf.mxu1 }
 0x209   :  { %v2683_v57 = vpop.f32.mrf.mxu2  ;;  %v2726_v61 = vadd.f32 %v2725_v11, %v2712_v56 }
 0x20a   :  { %v2684_v52 = vadd.f32 %v2683_v57, %v2670_v34  ;;  %v2713_v39 = vpop.f32.mrf.mxu0 }
 0x20b   :  { %v2714_v29 = vadd.f32 %v2713_v39, %v1947_v46 }
 0x210   :  { %v2727_v54 = vpop.f32.mrf.mxu1 }
 0x211   :  { %v2685_v2 = vpop.f32.mrf.mxu2  ;;  %v2728_v17 = vadd.f32 %v2727_v54, %v2714_v29 }
 0x212   :  { %v2686_v6 = vadd.f32 %v2685_v2, %v2672_v47 }
 0x21f   :  { %v2697_v59 = vpop.f32.mrf.mxu3 }
 0x220   :  { %v2698_v13 = vadd.f32 %v2697_v59, %v2684_v52 }
 0x222   :  { %2814 = vst [vmem:[#allocation10] sm:$0xff] %v2698_v13  ;;  %v2767_v0 = vpop.f32.mrf.mxu0 }
 0x227   :  { %v2699_v9 = vpop.f32.mrf.mxu3  ;;  %v2739_v63 = vpop.f32.mrf.mxu2 }
 0x228   :  { %v2700_v32 = vadd.f32 %v2699_v9, %v2686_v6  ;;  %v2740_v3 = vadd.f32 %v2739_v63, %v2726_v61  ;;  %v2781_v42 = vpop.f32.mrf.mxu1 }
 0x22a   :  { %2816 = vst [vmem:[#allocation10 + $0x10] sm:$0xff] %v2700_v32  ;;  %v2769_v19 = vpop.f32.mrf.mxu0 }
 0x22f   :  { %v2753_v41 = vpop.f32.mrf.mxu3  ;;  %v2741_v15 = vpop.f32.mrf.mxu2 }
 0x230   :  { %v2754_v51 = vadd.f32 %v2753_v41, %v2740_v3  ;;  %v2742_v22 = vadd.f32 %v2741_v15, %v2728_v17  ;;  %v2783_v44 = vpop.f32.mrf.mxu1 }
 0x232   :  { %v2768_v58 = vadd.f32 %v2767_v0, %v2754_v51 }
 0x234   :  { %v2782_v49 = vadd.f32 %v2781_v42, %v2768_v58 }
 0x237   :  { %v2755_v12 = vpop.f32.mrf.mxu3 }
 0x238   :  { %v2756_v1 = vadd.f32 %v2755_v12, %v2742_v22 }
 0x23a   :  { %v2770_v36 = vadd.f32 %v2769_v19, %v2756_v1 }
 0x23c   :  { %v2784_v45 = vadd.f32 %v2783_v44, %v2770_v36 }
 0x247   :  { %v2795_v31 = vpop.f32.mrf.mxu2 }
 0x248   :  { %v2796_v53 = vadd.f32 %v2795_v31, %v2782_v49 }
 0x24d   :  { %v2809_v21 = vpop.f32.mrf.mxu3 }
 0x24e   :  { %v2810_v35 = vadd.f32 %v2809_v21, %v2796_v53 }
 0x24f   :  { %v2797_v20 = vpop.f32.mrf.mxu2 }
 0x250   :  { %2815 = vst [vmem:[#allocation10 + $0x8] sm:$0xff] %v2810_v35  ;;  %v2798_v33 = vadd.f32 %v2797_v20, %v2784_v45 }
 0x255   :  { %v2811_v55 = vpop.f32.mrf.mxu3 }
 0x256   :  { %v2812_v5 = vadd.f32 %v2811_v55, %v2798_v33 }
 0x258   :  { %2817 = vst [vmem:[#allocation10 + $0x18] sm:$0xff] %v2812_v5 }
 0x259   :  { %2830 = dma.vmem_to_hbm [thread:$0]  %s2823_s15, 512, %s2825_s18, [#allocation4], %s4326_s19, %s4326_s19, %s4327_s20  }
 0x25a   :  { %4315 = dma.done.wait [#allocation4], 512  }
 0x25b   :  { %4316 = vsyncadd [#allocation4], 4294966784 }
 0x25c   :  { %2835 = vsyncpa [#allocation3], 1 }
 0x25d   :  { %2836 = vsyncpa [#allocation6], 1 }
 0x25e   :  { %2837 = vsyncpa [#allocation9], 1 }
 0x25f   :  { %2838 = vsyncpa [#allocation4], 1 }

</bundles_post_ra>
